<compile_context>
chip_gen: v7x
topology: tpu7x:2x2x1
jax: 0.10.0
libtpu: 0.0.40
codegen_flags: <defaults>
</compile_context>

<pallas_src>
import functools

import jax
import jax.numpy as jnp
from jax import lax
from jax.experimental import pallas as pl
from jax.experimental.pallas import tpu as pltpu


# ---------------------------------------------------------------------------
# Kernel
# ---------------------------------------------------------------------------
def _propogator_kernel(
    x_ref,        # (B_blk, d, tn)   channel-major node features (caller dtype)
    h_ref,        # (B_blk, D, n)    channel-major hidden state (caller dtype, full n)
    A_ref,        # (B_blk, n, tn)   adjacency column tile (caller dtype)
    Wzr_S_ref,    # (2D, D)          fused [Wz_S ; Wr_S]   (compute dtype)
    Wzrt_x_ref,   # (3D, d)          fused [Wz_x ; Wr_x ; Wt_x]
    Wt_S_ref,     # (D, D)
    Wo_ref,       # (d, D)
    bzr_ref,      # (2D, 1)          fused [bz ; br]       (f32)
    bt_ref,       # (D, 1)
    bo_ref,       # (d, 1)
    o_ref,        # (B_blk, d, tn)   channel-major output
    h_out_ref,    # (B_blk, D, tn)   new hidden state, already in module layout
    *, D, compute_dtype,
):
    B_blk = h_ref.shape[0]
    tn = A_ref.shape[-1]
    dF = o_ref.shape[1]

    # Weights / biases: loaded once per grid step (hoisted out of the batch loop).
    Wzr_S = Wzr_S_ref[...]
    Wzrt_x = Wzrt_x_ref[...]
    Wt_S = Wt_S_ref[...]
    Wo = Wo_ref[...]
    bzr = bzr_ref[...]
    # Pre-broadcast biases to the lane width once (JAX does not CSE broadcast_in_dim).
    bz = jnp.broadcast_to(bzr[:D], (D, tn))
    br = jnp.broadcast_to(bzr[D:], (D, tn))
    bt = jnp.broadcast_to(bt_ref[...], (D, tn))
    bo = jnp.broadcast_to(bo_ref[...], (dF, tn))

    def body(bb, carry):
        # Cast HBM-streamed f32 tiles to the compute dtype in-kernel (cheap VPU cast,
        # avoids a separate wrapper pass over A / hState).
        hS = h_ref[bb].astype(compute_dtype)     # (D, n)
        Ab = A_ref[bb].astype(compute_dtype)     # (n, tn)
        xb = x_ref[bb].astype(compute_dtype)     # (d, tn)

        # S (channel-major) = hState @ A -> (D, tn); f32 accumulation on the MXU.
        S = jnp.dot(hS, Ab, preferred_element_type=jnp.float32)

        # Fused gate matmuls: one S-side push for z|r, one x-side push for z|r|t.
        zr = jnp.dot(Wzr_S, S.astype(Wzr_S.dtype), preferred_element_type=jnp.float32)
        xp = jnp.dot(Wzrt_x, xb, preferred_element_type=jnp.float32)

        z = jax.nn.sigmoid(zr[:D] + xp[:D] + bz)          # module's `z` (resetGate branch)
        r = jax.nn.sigmoid(zr[D:] + xp[D:2 * D] + br)     # module's `r` (updateGate branch)

        hHat = jnp.tanh(
            jnp.dot(Wt_S, (r * S).astype(Wt_S.dtype), preferred_element_type=jnp.float32)
            + xp[2 * D:]
            + bt
        )

        h = (1.0 - z) * S + z * hHat                      # (D, tn) f32

        o = jax.nn.sigmoid(
            jnp.dot(Wo, h.astype(Wo.dtype), preferred_element_type=jnp.float32) + bo
        )                                                 # (d, tn)

        h_out_ref[bb] = h.astype(h_out_ref.dtype)
        o_ref[bb] = o.astype(o_ref.dtype)
        return carry

    # fori_loop bounds per-batch live ranges (no spills); unroll=True keeps LLO visibility.
    lax.fori_loop(0, B_blk, body, None, unroll=True)


# ---------------------------------------------------------------------------
# Sizing heuristics (generation-aware)
# ---------------------------------------------------------------------------
def _vmem_capacity_bytes():
    """Physical VMEM of the attached chip (64 MiB on v7x, 128 MiB on v5e/v6e)."""
    try:
        cap = int(pltpu.get_tpu_info().vmem_capacity_bytes)
        if cap > 0:
            return cap
    except Exception:
        pass
    try:
        kind = jax.devices()[0].device_kind.lower()
    except Exception:
        kind = ""
    if "v7" in kind:
        return 64 * 1024 * 1024
    return 128 * 1024 * 1024


def _is_multi_tc_chip():
    """Only v7x has 2 TensorCores per chip; elsewhere the grid is a serial loop."""
    try:
        kind = jax.devices()[0].device_kind.lower()
    except Exception:
        return False
    return "v7" in kind


def _pick_col_tile(n, itemsize, target_bytes=2 * 1024 * 1024):
    """A-column (lane) tile: ~target_bytes per (n, tn) slab; multiple of 128 or full n."""
    if n % 128 != 0:
        return n                                  # (8,128) rule: must use the full extent
    tn = (target_bytes // max(1, n * itemsize)) // 128 * 128
    tn = max(128, min(int(tn), n))
    while n % tn:
        tn -= 128
    return max(tn, 128)


def _pick_batch_block(b, n, tn, itemsize, vmem_limit, target_bytes=4 * 1024 * 1024):
    """Batches per grid step, sized by DMA-tile bytes (~1-4 MiB of A) and VMEM budget."""
    if b <= 1:
        return 1
    per_batch = max(1, n * tn * itemsize)                       # dominant per-batch A slab
    vmem_cap = max(1, (vmem_limit // 3) // (2 * per_batch))     # double-buffered A <= ~1/3
    bb = max(1, min(b, target_bytes // per_batch, vmem_cap))
    bb = int(bb)
    while b % bb:                                               # clean blocking: divisor of b
        bb -= 1
    return max(bb, 1)


# ---------------------------------------------------------------------------
# Wrapper
# ---------------------------------------------------------------------------
def propogator_forward(x, hState, A, params, *, compute_dtype=jnp.bfloat16):
    """Pallas forward pass. Returns (o [b, n, d], hState_out [b, D, n])."""
    b, n, d = x.shape
    D = hState.shape[1]
    assert hState.shape == (b, D, n)
    assert A.shape == (b, n, n)

    # Only the tiny x tensor is transposed in the wrapper; A / hState stream in unchanged
    # (caller dtype; cast to compute_dtype happens inside the kernel).
    x_cm = jnp.transpose(x, (0, 2, 1))            # [b, d, n]

    # PyTorch Linear: y = cat(S, x) @ W.T + b, W: [D_out, D + d].
    # Channel-major: y_cm = W_S @ S_cm + W_x @ x_cm + b[:, None].  Fuse z|r (S side) and
    # z|r|t (x side) along the output-row dim.
    Wz, Wr, Wt, Wo = params["Wz"], params["Wr"], params["Wt"], params["Wo"]
    Wzr_S = jnp.concatenate([Wz[:, :D], Wr[:, :D]], axis=0).astype(compute_dtype)            # (2D, D)
    Wzrt_x = jnp.concatenate([Wz[:, D:], Wr[:, D:], Wt[:, D:]], axis=0).astype(compute_dtype)  # (3D, d)
    Wt_S = Wt[:, :D].astype(compute_dtype)                                                    # (D, D)
    Wo_m = Wo.astype(compute_dtype)                                                           # (d, D)
    bzr = jnp.concatenate([params["bz"], params["br"]]).reshape(2 * D, 1).astype(jnp.float32)
    bt = params["bt"].reshape(D, 1).astype(jnp.float32)
    bo = params["bo"].reshape(d, 1).astype(jnp.float32)

    itemsize = jnp.dtype(A.dtype).itemsize
    vmem_cap = _vmem_capacity_bytes()
    vmem_limit = int(vmem_cap * 3 // 4)           # 48 MiB on v7x, 96 MiB on v5e/v6e

    tn = _pick_col_tile(n, itemsize)
    B_blk = _pick_batch_block(b, n, tn, itemsize, vmem_limit)

    grid_b = b // B_blk
    grid_n = n // tn
    if grid_b * grid_n == 1 and b > 1 and _is_multi_tc_chip():
        # v7x (2 TC/chip): give each TensorCore at least one grid step to shard across.
        bb = max(1, B_blk // 2)
        while b % bb:
            bb -= 1
        B_blk = bb
        grid_b = b // B_blk
    grid = (grid_b, grid_n)

    # BlockSpecs: 2D grid (i = batch block, j = A-column tile).  hState stays a full-(D,n)
    # block whose index is constant along the innermost j axis (stays resident, no re-DMA).
    col_spec = lambda c: pl.BlockSpec((B_blk, c, tn), lambda i, j: (i, 0, j))
    h_spec = pl.BlockSpec((B_blk, D, n), lambda i, j: (i, 0, 0))
    A_spec = pl.BlockSpec((B_blk, n, tn), lambda i, j: (i, 0, j))
    full_spec = lambda r, c: pl.BlockSpec((r, c), lambda i, j: (0, 0))

    out_itemsize = jnp.dtype(x.dtype).itemsize
    cost = pl.CostEstimate(
        flops=int(2 * b * D * n * n + 2 * b * n * (3 * D * D + 4 * D * d)),
        transcendentals=int(b * n * (3 * D + d)),
        bytes_accessed=int(
            A.size * itemsize
            + hState.size * jnp.dtype(hState.dtype).itemsize
            + x.size * jnp.dtype(x.dtype).itemsize
            + (b * n * d + b * D * n) * out_itemsize
        ),
    )

    kernel = functools.partial(_propogator_kernel, D=D, compute_dtype=compute_dtype)

    o_cm, h_out = pl.pallas_call(
        kernel,
        grid=grid,
        in_specs=[
            col_spec(d),                       # x_cm (column-tiled)
            h_spec,                            # hState (full n: contraction dim)
            A_spec,                            # A (column-tiled)
            full_spec(2 * D, D),               # Wzr_S
            full_spec(3 * D, d),               # Wzrt_x
            full_spec(D, D),                   # Wt_S
            full_spec(d, D),                   # Wo
            full_spec(2 * D, 1),               # bzr
            full_spec(D, 1),                   # bt
            full_spec(d, 1),                   # bo
        ],
        out_specs=[
            col_spec(d),                                            # o (channel-major)
            pl.BlockSpec((B_blk, D, tn), lambda i, j: (i, 0, j)),   # h_out ([b, D, n])
        ],
        out_shape=[
            jax.ShapeDtypeStruct((b, d, n), x.dtype),
            jax.ShapeDtypeStruct((b, D, n), hState.dtype),
        ],
        compiler_params=pltpu.CompilerParams(
            dimension_semantics=("parallel", "parallel"),
            vmem_limit_bytes=vmem_limit,
        ),
        cost_estimate=cost,
    )(x_cm, hState, A, Wzr_S, Wzrt_x, Wt_S, Wo_m, bzr, bt, bo)

    o = jnp.transpose(o_cm, (0, 2, 1))         # [b, n, d] (tiny transpose)
    return o, h_out


# ---------------------------------------------------------------------------
# Pure-JAX reference + init (verification only)
# ---------------------------------------------------------------------------
def _reference_forward(x, hState, A, params):
    """Pure-JAX reference mirroring the PyTorch code."""
    S = jnp.einsum("bDn,bnm->bDm", hState, A)          # bmm(hState, A)
    S = jnp.transpose(S, (0, 2, 1))                    # [b, n, D]
    i = jnp.concatenate((S, x), axis=2)
    z = jax.nn.sigmoid(jnp.einsum("bni,oi->bno", i, params["Wz"]) + params["bz"])
    r = jax.nn.sigmoid(jnp.einsum("bni,oi->bno", i, params["Wr"]) + params["br"])
    jointI = jnp.concatenate((r * S, x), axis=2)
    hHat = jnp.tanh(jnp.einsum("bni,oi->bno", jointI, params["Wt"]) + params["bt"])
    h = (1.0 - z) * S + z * hHat
    o = jax.nn.sigmoid(jnp.einsum("bnD,dD->bnd", h, params["Wo"]) + params["bo"])
    return o, jnp.transpose(h, (0, 2, 1))


def init_params(key, dimHidden, dimFeature):
    """Deterministic PyTorch-style uniform(-1/sqrt(fan_in), 1/sqrt(fan_in)) init."""
    D, d = dimHidden, dimFeature
    keys = jax.random.split(key, 8)

    def lin(kw, kb, out_dim, in_dim):
        bound = 1.0 / jnp.sqrt(in_dim)
        W = jax.random.uniform(kw, (out_dim, in_dim), jnp.float32, -bound, bound)
        bvec = jax.random.uniform(kb, (out_dim,), jnp.float32, -bound, bound)
        return W, bvec

    Wz, bz = lin(keys[0], keys[1], D, D + d)
    Wr, br = lin(keys[2], keys[3], D, D + d)
    Wt, bt = lin(keys[4], keys[5], D, D + d)
    Wo, bo = lin(keys[6], keys[7], d, D)
    return dict(Wz=Wz, bz=bz, Wr=Wr, br=br, Wt=Wt, bt=bt, Wo=Wo, bo=bo)


if __name__ == "__main__":
    # Small shapes implied by the module: batchSize, nNode, dimFeature, dimHidden
    batchSize, nNode, dimFeature, dimHidden = 2, 8, 4, 32

    key = jax.random.PRNGKey(0)
    k_x, k_h, k_a, k_p = jax.random.split(key, 4)

    x = jax.random.normal(k_x, (batchSize, nNode, dimFeature), jnp.float32)
    hState = jax.random.normal(k_h, (batchSize, dimHidden, nNode), jnp.float32)
    A = jax.random.normal(k_a, (batchSize, nNode, nNode), jnp.float32)
    params = init_params(k_p, dimHidden, dimFeature)

    o_ref, h_ref = _reference_forward(x, hState, A, params)

    # 1) Exact-math check: run the kernel in f32 and compare tightly.
    o32, h32 = propogator_forward(x, hState, A, params, compute_dtype=jnp.float32)
    o32 = jax.block_until_ready(o32)
    h32 = jax.block_until_ready(h32)
    assert o32.shape == (batchSize, nNode, dimFeature)
    assert h32.shape == (batchSize, dimHidden, nNode)
    assert jnp.allclose(o32, o_ref, atol=1e-5, rtol=1e-5)
    assert jnp.allclose(h32, h_ref, atol=1e-5, rtol=1e-5)

    # 2) Performance configuration: bf16 MXU inputs, f32 accumulation (looser tolerance).
    o, h_out = propogator_forward(x, hState, A, params)
    o = jax.block_until_ready(o)
    h_out = jax.block_until_ready(h_out)
    assert o.shape == (batchSize, nNode, dimFeature)
    assert h_out.shape == (batchSize, dimHidden, nNode)
    assert jnp.allclose(o, o_ref, atol=5e-2, rtol=5e-2)
    assert jnp.allclose(h_out, h_ref, atol=5e-2, rtol=5e-2)

    print("KERNEL_OK")
</pallas_src>

<mosaic_0001>
module attributes {stable_mosaic.version = 11 : i64} {
  func.func @_propogator_kernel(%arg0: i32, %arg1: i32, %arg2: memref<2x4x8xf32, #tpu.memory_space<vmem>>, %arg3: memref<2x32x8xf32, #tpu.memory_space<vmem>>, %arg4: memref<2x8x8xf32, #tpu.memory_space<vmem>>, %arg5: memref<64x32xf32, #tpu.memory_space<vmem>>, %arg6: memref<96x4xf32, #tpu.memory_space<vmem>>, %arg7: memref<32x32xf32, #tpu.memory_space<vmem>>, %arg8: memref<4x32xf32, #tpu.memory_space<vmem>>, %arg9: memref<64x1xf32, #tpu.memory_space<vmem>>, %arg10: memref<32x1xf32, #tpu.memory_space<vmem>>, %arg11: memref<4x1xf32, #tpu.memory_space<vmem>>, %arg12: memref<2x4x8xf32, #tpu.memory_space<vmem>>, %arg13: memref<2x32x8xf32, #tpu.memory_space<vmem>>) attributes {dimension_semantics = [#tpu.dimension_semantics<parallel>, #tpu.dimension_semantics<parallel>], iteration_bounds = array<i64: 1, 1>, scalar_prefetch = 0 : i64, scratch_operands = 0 : i64, tpu.core_type = #tpu.core_type<tc>, window_params = [{transform_indices = @transform_0, window_bounds = array<i64: 2, 4, 8>}, {transform_indices = @transform_1, window_bounds = array<i64: 2, 32, 8>}, {transform_indices = @transform_2, window_bounds = array<i64: 2, 8, 8>}, {pipeline_mode = #tpu.pipeline_mode<synchronous>, transform_indices = @transform_3, window_bounds = array<i64: 64, 32>}, {pipeline_mode = #tpu.pipeline_mode<synchronous>, transform_indices = @transform_4, window_bounds = array<i64: 96, 4>}, {pipeline_mode = #tpu.pipeline_mode<synchronous>, transform_indices = @transform_5, window_bounds = array<i64: 32, 32>}, {pipeline_mode = #tpu.pipeline_mode<synchronous>, transform_indices = @transform_6, window_bounds = array<i64: 4, 32>}, {pipeline_mode = #tpu.pipeline_mode<synchronous>, transform_indices = @transform_7, window_bounds = array<i64: 64, 1>}, {pipeline_mode = #tpu.pipeline_mode<synchronous>, transform_indices = @transform_8, window_bounds = array<i64: 32, 1>}, {pipeline_mode = #tpu.pipeline_mode<synchronous>, transform_indices = @transform_9, window_bounds = array<i64: 4, 1>}, {transform_indices = @transform_10, window_bounds = array<i64: 2, 4, 8>}, {transform_indices = @transform_11, window_bounds = array<i64: 2, 32, 8>}]} {
    %c0 = arith.constant 0 : index
    %c0_0 = arith.constant 0 : index
    %0 = vector.load %arg5[%c0, %c0_0] : memref<64x32xf32, #tpu.memory_space<vmem>>, vector<64x32xf32>
    %c0_1 = arith.constant 0 : index
    %c0_2 = arith.constant 0 : index
    %1 = vector.load %arg6[%c0_1, %c0_2] : memref<96x4xf32, #tpu.memory_space<vmem>>, vector<96x4xf32>
    %c0_3 = arith.constant 0 : index
    %c0_4 = arith.constant 0 : index
    %2 = vector.load %arg7[%c0_3, %c0_4] : memref<32x32xf32, #tpu.memory_space<vmem>>, vector<32x32xf32>
    %c0_5 = arith.constant 0 : index
    %c0_6 = arith.constant 0 : index
    %3 = vector.load %arg8[%c0_5, %c0_6] : memref<4x32xf32, #tpu.memory_space<vmem>>, vector<4x32xf32>
    %c0_7 = arith.constant 0 : index
    %c0_8 = arith.constant 0 : index
    %4 = vector.load %arg9[%c0_7, %c0_8] : memref<64x1xf32, #tpu.memory_space<vmem>>, vector<64x1xf32>
    %5 = vector.extract_strided_slice %4 {offsets = [0, 0], sizes = [32, 1], strides = [1, 1]} : vector<64x1xf32> to vector<32x1xf32>
    %6 = vector.shape_cast %5 : vector<32x1xf32> to vector<32x1xf32>
    %7 = vector.broadcast %6 : vector<32x1xf32> to vector<32x8xf32>
    %8 = vector.extract_strided_slice %4 {offsets = [32, 0], sizes = [32, 1], strides = [1, 1]} : vector<64x1xf32> to vector<32x1xf32>
    %9 = vector.shape_cast %8 : vector<32x1xf32> to vector<32x1xf32>
    %10 = vector.broadcast %9 : vector<32x1xf32> to vector<32x8xf32>
    %c0_9 = arith.constant 0 : index
    %c0_10 = arith.constant 0 : index
    %11 = vector.load %arg10[%c0_9, %c0_10] : memref<32x1xf32, #tpu.memory_space<vmem>>, vector<32x1xf32>
    %12 = vector.shape_cast %11 : vector<32x1xf32> to vector<32x1xf32>
    %13 = vector.broadcast %12 : vector<32x1xf32> to vector<32x8xf32>
    %c0_11 = arith.constant 0 : index
    %c0_12 = arith.constant 0 : index
    %14 = vector.load %arg11[%c0_11, %c0_12] : memref<4x1xf32, #tpu.memory_space<vmem>>, vector<4x1xf32>
    %15 = vector.shape_cast %14 : vector<4x1xf32> to vector<4x1xf32>
    %16 = vector.broadcast %15 : vector<4x1xf32> to vector<4x8xf32>
    %c0_i32 = arith.constant 0 : i32
    %17 = arith.index_cast %c0_i32 : i32 to index
    %c0_13 = arith.constant 0 : index
    %c0_14 = arith.constant 0 : index
    %18 = vector.load %arg3[%17, %c0_13, %c0_14] : memref<2x32x8xf32, #tpu.memory_space<vmem>>, vector<1x32x8xf32>
    %19 = vector.shape_cast %18 : vector<1x32x8xf32> to vector<32x8xf32>
    %20 = arith.index_cast %c0_i32 : i32 to index
    %c0_15 = arith.constant 0 : index
    %c0_16 = arith.constant 0 : index
    %21 = vector.load %arg4[%20, %c0_15, %c0_16] : memref<2x8x8xf32, #tpu.memory_space<vmem>>, vector<1x8x8xf32>
    %22 = vector.shape_cast %21 : vector<1x8x8xf32> to vector<8x8xf32>
    %23 = arith.index_cast %c0_i32 : i32 to index
    %c0_17 = arith.constant 0 : index
    %c0_18 = arith.constant 0 : index
    %24 = vector.load %arg2[%23, %c0_17, %c0_18] : memref<2x4x8xf32, #tpu.memory_space<vmem>>, vector<1x4x8xf32>
    %25 = vector.shape_cast %24 : vector<1x4x8xf32> to vector<4x8xf32>
    %cst = arith.constant dense<0.000000e+00> : vector<32x8xf32>
    %26 = tpu.matmul %19, %22, %cst {dimension_numbers = #tpu.dot_dimension_numbers<[1], [0], [0], [1], [0, 0, 1, 1], [], []>} : vector<32x8xf32>, vector<8x8xf32>, vector<32x8xf32> -> vector<32x8xf32>
    %cst_19 = arith.constant dense<0.000000e+00> : vector<64x8xf32>
    %27 = tpu.matmul %0, %26, %cst_19 {dimension_numbers = #tpu.dot_dimension_numbers<[1], [0], [0], [1], [0, 0, 1, 1], [], []>} : vector<64x32xf32>, vector<32x8xf32>, vector<64x8xf32> -> vector<64x8xf32>
    %cst_20 = arith.constant dense<0.000000e+00> : vector<96x8xf32>
    %28 = tpu.matmul %1, %25, %cst_20 {dimension_numbers = #tpu.dot_dimension_numbers<[1], [0], [0], [1], [0, 0, 1, 1], [], []>} : vector<96x4xf32>, vector<4x8xf32>, vector<96x8xf32> -> vector<96x8xf32>
    %29 = vector.extract_strided_slice %27 {offsets = [0, 0], sizes = [32, 8], strides = [1, 1]} : vector<64x8xf32> to vector<32x8xf32>
    %30 = vector.extract_strided_slice %28 {offsets = [0, 0], sizes = [32, 8], strides = [1, 1]} : vector<96x8xf32> to vector<32x8xf32>
    %31 = arith.addf %29, %30 : vector<32x8xf32>
    %32 = arith.addf %31, %7 : vector<32x8xf32>
    %33 = arith.negf %32 : vector<32x8xf32>
    %34 = math.exp %33 : vector<32x8xf32>
    %cst_21 = arith.constant 1.000000e+00 : f32
    %35 = vector.broadcast %cst_21 : f32 to vector<32x8xf32>
    %36 = arith.addf %35, %34 : vector<32x8xf32>
    %37 = arith.divf %35, %36 : vector<32x8xf32>
    %38 = vector.extract_strided_slice %27 {offsets = [32, 0], sizes = [32, 8], strides = [1, 1]} : vector<64x8xf32> to vector<32x8xf32>
    %39 = vector.extract_strided_slice %28 {offsets = [32, 0], sizes = [32, 8], strides = [1, 1]} : vector<96x8xf32> to vector<32x8xf32>
    %40 = arith.addf %38, %39 : vector<32x8xf32>
    %41 = arith.addf %40, %10 : vector<32x8xf32>
    %42 = arith.negf %41 : vector<32x8xf32>
    %43 = math.exp %42 : vector<32x8xf32>
    %cst_22 = arith.constant 1.000000e+00 : f32
    %44 = vector.broadcast %cst_22 : f32 to vector<32x8xf32>
    %45 = arith.addf %44, %43 : vector<32x8xf32>
    %46 = arith.divf %44, %45 : vector<32x8xf32>
    %47 = arith.mulf %46, %26 : vector<32x8xf32>
    %cst_23 = arith.constant dense<0.000000e+00> : vector<32x8xf32>
    %48 = tpu.matmul %2, %47, %cst_23 {dimension_numbers = #tpu.dot_dimension_numbers<[1], [0], [0], [1], [0, 0, 1, 1], [], []>} : vector<32x32xf32>, vector<32x8xf32>, vector<32x8xf32> -> vector<32x8xf32>
    %49 = vector.extract_strided_slice %28 {offsets = [64, 0], sizes = [32, 8], strides = [1, 1]} : vector<96x8xf32> to vector<32x8xf32>
    %50 = arith.addf %48, %49 : vector<32x8xf32>
    %51 = arith.addf %50, %13 : vector<32x8xf32>
    %52 = math.tanh %51 : vector<32x8xf32>
    %cst_24 = arith.constant 1.000000e+00 : f32
    %53 = vector.broadcast %cst_24 : f32 to vector<32x8xf32>
    %54 = arith.subf %53, %37 : vector<32x8xf32>
    %55 = arith.mulf %54, %26 : vector<32x8xf32>
    %56 = arith.mulf %37, %52 : vector<32x8xf32>
    %57 = arith.addf %55, %56 : vector<32x8xf32>
    %cst_25 = arith.constant dense<0.000000e+00> : vector<4x8xf32>
    %58 = tpu.matmul %3, %57, %cst_25 {dimension_numbers = #tpu.dot_dimension_numbers<[1], [0], [0], [1], [0, 0, 1, 1], [], []>} : vector<4x32xf32>, vector<32x8xf32>, vector<4x8xf32> -> vector<4x8xf32>
    %59 = arith.addf %58, %16 : vector<4x8xf32>
    %60 = arith.negf %59 : vector<4x8xf32>
    %61 = math.exp %60 : vector<4x8xf32>
    %cst_26 = arith.constant 1.000000e+00 : f32
    %62 = vector.broadcast %cst_26 : f32 to vector<4x8xf32>
    %63 = arith.addf %62, %61 : vector<4x8xf32>
    %64 = arith.divf %62, %63 : vector<4x8xf32>
    %65 = arith.index_cast %c0_i32 : i32 to index
    %c0_27 = arith.constant 0 : index
    %c0_28 = arith.constant 0 : index
    %66 = vector.load %arg13[%65, %c0_27, %c0_28] : memref<2x32x8xf32, #tpu.memory_space<vmem>>, vector<1x32x8xf32>
    %67 = vector.shape_cast %66 : vector<1x32x8xf32> to vector<32x8xf32>
    %68 = vector.shape_cast %57 : vector<32x8xf32> to vector<1x32x8xf32>
    tpu.vector_store %arg13[%65, %c0_27, %c0_28], %68 {strides = array<i32>} : memref<2x32x8xf32, #tpu.memory_space<vmem>>, vector<1x32x8xf32>,
    %69 = arith.index_cast %c0_i32 : i32 to index
    %c0_29 = arith.constant 0 : index
    %c0_30 = arith.constant 0 : index
    %70 = vector.load %arg12[%69, %c0_29, %c0_30] : memref<2x4x8xf32, #tpu.memory_space<vmem>>, vector<1x4x8xf32>
    %71 = vector.shape_cast %70 : vector<1x4x8xf32> to vector<4x8xf32>
    %72 = vector.shape_cast %64 : vector<4x8xf32> to vector<1x4x8xf32>
    tpu.vector_store %arg12[%69, %c0_29, %c0_30], %72 {strides = array<i32>} : memref<2x4x8xf32, #tpu.memory_space<vmem>>, vector<1x4x8xf32>,
    %c1_i32 = arith.constant 1 : i32
    %73 = arith.index_cast %c1_i32 : i32 to index
    %c0_31 = arith.constant 0 : index
    %c0_32 = arith.constant 0 : index
    %74 = vector.load %arg3[%73, %c0_31, %c0_32] : memref<2x32x8xf32, #tpu.memory_space<vmem>>, vector<1x32x8xf32>
    %75 = vector.shape_cast %74 : vector<1x32x8xf32> to vector<32x8xf32>
    %76 = arith.index_cast %c1_i32 : i32 to index
    %c0_33 = arith.constant 0 : index
    %c0_34 = arith.constant 0 : index
    %77 = vector.load %arg4[%76, %c0_33, %c0_34] : memref<2x8x8xf32, #tpu.memory_space<vmem>>, vector<1x8x8xf32>
    %78 = vector.shape_cast %77 : vector<1x8x8xf32> to vector<8x8xf32>
    %79 = arith.index_cast %c1_i32 : i32 to index
    %c0_35 = arith.constant 0 : index
    %c0_36 = arith.constant 0 : index
    %80 = vector.load %arg2[%79, %c0_35, %c0_36] : memref<2x4x8xf32, #tpu.memory_space<vmem>>, vector<1x4x8xf32>
    %81 = vector.shape_cast %80 : vector<1x4x8xf32> to vector<4x8xf32>
    %cst_37 = arith.constant dense<0.000000e+00> : vector<32x8xf32>
    %82 = tpu.matmul %75, %78, %cst_37 {dimension_numbers = #tpu.dot_dimension_numbers<[1], [0], [0], [1], [0, 0, 1, 1], [], []>} : vector<32x8xf32>, vector<8x8xf32>, vector<32x8xf32> -> vector<32x8xf32>
    %cst_38 = arith.constant dense<0.000000e+00> : vector<64x8xf32>
    %83 = tpu.matmul %0, %82, %cst_38 {dimension_numbers = #tpu.dot_dimension_numbers<[1], [0], [0], [1], [0, 0, 1, 1], [], []>} : vector<64x32xf32>, vector<32x8xf32>, vector<64x8xf32> -> vector<64x8xf32>
    %cst_39 = arith.constant dense<0.000000e+00> : vector<96x8xf32>
    %84 = tpu.matmul %1, %81, %cst_39 {dimension_numbers = #tpu.dot_dimension_numbers<[1], [0], [0], [1], [0, 0, 1, 1], [], []>} : vector<96x4xf32>, vector<4x8xf32>, vector<96x8xf32> -> vector<96x8xf32>
    %85 = vector.extract_strided_slice %83 {offsets = [0, 0], sizes = [32, 8], strides = [1, 1]} : vector<64x8xf32> to vector<32x8xf32>
    %86 = vector.extract_strided_slice %84 {offsets = [0, 0], sizes = [32, 8], strides = [1, 1]} : vector<96x8xf32> to vector<32x8xf32>
    %87 = arith.addf %85, %86 : vector<32x8xf32>
    %88 = arith.addf %87, %7 : vector<32x8xf32>
    %89 = arith.negf %88 : vector<32x8xf32>
    %90 = math.exp %89 : vector<32x8xf32>
    %cst_40 = arith.constant 1.000000e+00 : f32
    %91 = vector.broadcast %cst_40 : f32 to vector<32x8xf32>
    %92 = arith.addf %91, %90 : vector<32x8xf32>
    %93 = arith.divf %91, %92 : vector<32x8xf32>
    %94 = vector.extract_strided_slice %83 {offsets = [32, 0], sizes = [32, 8], strides = [1, 1]} : vector<64x8xf32> to vector<32x8xf32>
    %95 = vector.extract_strided_slice %84 {offsets = [32, 0], sizes = [32, 8], strides = [1, 1]} : vector<96x8xf32> to vector<32x8xf32>
    %96 = arith.addf %94, %95 : vector<32x8xf32>
    %97 = arith.addf %96, %10 : vector<32x8xf32>
    %98 = arith.negf %97 : vector<32x8xf32>
    %99 = math.exp %98 : vector<32x8xf32>
    %cst_41 = arith.constant 1.000000e+00 : f32
    %100 = vector.broadcast %cst_41 : f32 to vector<32x8xf32>
    %101 = arith.addf %100, %99 : vector<32x8xf32>
    %102 = arith.divf %100, %101 : vector<32x8xf32>
    %103 = arith.mulf %102, %82 : vector<32x8xf32>
    %cst_42 = arith.constant dense<0.000000e+00> : vector<32x8xf32>
    %104 = tpu.matmul %2, %103, %cst_42 {dimension_numbers = #tpu.dot_dimension_numbers<[1], [0], [0], [1], [0, 0, 1, 1], [], []>} : vector<32x32xf32>, vector<32x8xf32>, vector<32x8xf32> -> vector<32x8xf32>
    %105 = vector.extract_strided_slice %84 {offsets = [64, 0], sizes = [32, 8], strides = [1, 1]} : vector<96x8xf32> to vector<32x8xf32>
    %106 = arith.addf %104, %105 : vector<32x8xf32>
    %107 = arith.addf %106, %13 : vector<32x8xf32>
    %108 = math.tanh %107 : vector<32x8xf32>
    %cst_43 = arith.constant 1.000000e+00 : f32
    %109 = vector.broadcast %cst_43 : f32 to vector<32x8xf32>
    %110 = arith.subf %109, %93 : vector<32x8xf32>
    %111 = arith.mulf %110, %82 : vector<32x8xf32>
    %112 = arith.mulf %93, %108 : vector<32x8xf32>
    %113 = arith.addf %111, %112 : vector<32x8xf32>
    %cst_44 = arith.constant dense<0.000000e+00> : vector<4x8xf32>
    %114 = tpu.matmul %3, %113, %cst_44 {dimension_numbers = #tpu.dot_dimension_numbers<[1], [0], [0], [1], [0, 0, 1, 1], [], []>} : vector<4x32xf32>, vector<32x8xf32>, vector<4x8xf32> -> vector<4x8xf32>
    %115 = arith.addf %114, %16 : vector<4x8xf32>
    %116 = arith.negf %115 : vector<4x8xf32>
    %117 = math.exp %116 : vector<4x8xf32>
    %cst_45 = arith.constant 1.000000e+00 : f32
    %118 = vector.broadcast %cst_45 : f32 to vector<4x8xf32>
    %119 = arith.addf %118, %117 : vector<4x8xf32>
    %120 = arith.divf %118, %119 : vector<4x8xf32>
    %121 = arith.index_cast %c1_i32 : i32 to index
    %c0_46 = arith.constant 0 : index
    %c0_47 = arith.constant 0 : index
    %122 = vector.load %arg13[%121, %c0_46, %c0_47] : memref<2x32x8xf32, #tpu.memory_space<vmem>>, vector<1x32x8xf32>
    %123 = vector.shape_cast %122 : vector<1x32x8xf32> to vector<32x8xf32>
    %124 = vector.shape_cast %113 : vector<32x8xf32> to vector<1x32x8xf32>
    tpu.vector_store %arg13[%121, %c0_46, %c0_47], %124 {strides = array<i32>} : memref<2x32x8xf32, #tpu.memory_space<vmem>>, vector<1x32x8xf32>,
    %125 = arith.index_cast %c1_i32 : i32 to index
    %c0_48 = arith.constant 0 : index
    %c0_49 = arith.constant 0 : index
    %126 = vector.load %arg12[%125, %c0_48, %c0_49] : memref<2x4x8xf32, #tpu.memory_space<vmem>>, vector<1x4x8xf32>
    %127 = vector.shape_cast %126 : vector<1x4x8xf32> to vector<4x8xf32>
    %128 = vector.shape_cast %120 : vector<4x8xf32> to vector<1x4x8xf32>
    tpu.vector_store %arg12[%125, %c0_48, %c0_49], %128 {strides = array<i32>} : memref<2x4x8xf32, #tpu.memory_space<vmem>>, vector<1x4x8xf32>,
    %c2_i32 = arith.constant 2 : i32
    return
  }
  func.func @transform_0(%arg0: i32, %arg1: i32) -> (i32, i32, i32) {
    %c0_i32 = arith.constant 0 : i32
    %c0_i32_0 = arith.constant 0 : i32
    return %arg0, %c0_i32, %arg1 : i32, i32, i32
  }
  func.func @transform_1(%arg0: i32, %arg1: i32) -> (i32, i32, i32) {
    %c0_i32 = arith.constant 0 : i32
    %c0_i32_0 = arith.constant 0 : i32
    %c0_i32_1 = arith.constant 0 : i32
    return %arg0, %c0_i32, %c0_i32_0 : i32, i32, i32
  }
  func.func @transform_2(%arg0: i32, %arg1: i32) -> (i32, i32, i32) {
    %c0_i32 = arith.constant 0 : i32
    %c0_i32_0 = arith.constant 0 : i32
    return %arg0, %c0_i32, %arg1 : i32, i32, i32
  }
  func.func @transform_3(%arg0: i32, %arg1: i32) -> (i32, i32) {
    %c0_i32 = arith.constant 0 : i32
    %c0_i32_0 = arith.constant 0 : i32
    %c0_i32_1 = arith.constant 0 : i32
    return %c0_i32, %c0_i32_0 : i32, i32
  }
  func.func @transform_4(%arg0: i32, %arg1: i32) -> (i32, i32) {
    %c0_i32 = arith.constant 0 : i32
    %c0_i32_0 = arith.constant 0 : i32
    %c0_i32_1 = arith.constant 0 : i32
    return %c0_i32, %c0_i32_0 : i32, i32
  }
  func.func @transform_5(%arg0: i32, %arg1: i32) -> (i32, i32) {
    %c0_i32 = arith.constant 0 : i32
    %c0_i32_0 = arith.constant 0 : i32
    %c0_i32_1 = arith.constant 0 : i32
    return %c0_i32, %c0_i32_0 : i32, i32
  }
  func.func @transform_6(%arg0: i32, %arg1: i32) -> (i32, i32) {
    %c0_i32 = arith.constant 0 : i32
    %c0_i32_0 = arith.constant 0 : i32
    %c0_i32_1 = arith.constant 0 : i32
    return %c0_i32, %c0_i32_0 : i32, i32
  }
  func.func @transform_7(%arg0: i32, %arg1: i32) -> (i32, i32) {
    %c0_i32 = arith.constant 0 : i32
    %c0_i32_0 = arith.constant 0 : i32
    %c0_i32_1 = arith.constant 0 : i32
    return %c0_i32, %c0_i32_0 : i32, i32
  }
  func.func @transform_8(%arg0: i32, %arg1: i32) -> (i32, i32) {
    %c0_i32 = arith.constant 0 : i32
    %c0_i32_0 = arith.constant 0 : i32
    %c0_i32_1 = arith.constant 0 : i32
    return %c0_i32, %c0_i32_0 : i32, i32
  }
  func.func @transform_9(%arg0: i32, %arg1: i32) -> (i32, i32) {
    %c0_i32 = arith.constant 0 : i32
    %c0_i32_0 = arith.constant 0 : i32
    %c0_i32_1 = arith.constant 0 : i32
    return %c0_i32, %c0_i32_0 : i32, i32
  }
  func.func @transform_10(%arg0: i32, %arg1: i32) -> (i32, i32, i32) {
    %c0_i32 = arith.constant 0 : i32
    %c0_i32_0 = arith.constant 0 : i32
    return %arg0, %c0_i32, %arg1 : i32, i32, i32
  }
  func.func @transform_11(%arg0: i32, %arg1: i32) -> (i32, i32, i32) {
    %c0_i32 = arith.constant 0 : i32
    %c0_i32_0 = arith.constant 0 : i32
    return %arg0, %c0_i32, %arg1 : i32, i32, i32
  }
}

</mosaic_0001>

<bundles_post_ra>
// kernel: tpu_custom_call.1
= control target key start
LH: loop header
LB: loop body
LE: loop exit
PB: predicated region body
PF: predicated region fallthrough
CT: control target
= control target key end

     0   :  { %17 = vsyncpa [#allocation3], 0  ;;  %s2875_s0 = inlined_call_operand.hbm [shape: f32[2,4,8], index: 0, kind: input, shape index: {}]   ;;  %s2876_s1 = inlined_call_operand.hbm [shape: f32[2,32,8], index: 1, kind: input, shape index: {}]   ;;  %s2877_s2 = inlined_call_operand.hbm [shape: f32[2,8,8], index: 2, kind: input, shape index: {}]   ;;  %s2878_s3 = inlined_call_operand.hbm [shape: f32[64,32], index: 3, kind: input, shape index: {}]   ;;  %s2879_s4 = inlined_call_operand.hbm [shape: f32[96,4], index: 4, kind: input, shape index: {}]   ;;  %s2880_s5 = inlined_call_operand.hbm [shape: f32[32,32], index: 5, kind: input, shape index: {}]   ;;  %s2881_s6 = inlined_call_operand.hbm [shape: f32[4,32], index: 6, kind: input, shape index: {}]   ;;  %s2882_s7 = inlined_call_operand.hbm [shape: f32[64,1], index: 7, kind: input, shape index: {}]   ;;  %s2883_s8 = inlined_call_operand.hbm [shape: f32[32,1], index: 8, kind: input, shape index: {}]   ;;  %s2884_s9 = inlined_call_operand.hbm [shape: f32[4,1], index: 9, kind: input, shape index: {}]   ;;  %s2885_s10 = inlined_call_operand.hbm [shape: f32[2,4,8], index: 10, kind: output, shape index: {0}]   ;;  %s2886_s11 = inlined_call_operand.hbm [shape: f32[2,32,8], index: 11, kind: output, shape index: {1}]  }
   0x1   :  { %18 = vsyncpa [#allocation6], 0 }
   0x2   :  { %19 = vsyncpa [#allocation9], 0 }
   0x3   :  { %20 = vsyncpa [#allocation12], 0 }
   0x4   :  { %21 = vsyncpa [#allocation15], 0 }
   0x5   :  { %22 = vsyncpa [#allocation18], 0 }
   0x6   :  { %23 = vsyncpa [#allocation4], 0 }
   0x7   :  { %24 = vsyncpa [#allocation21], 0  ;;  %s2353_s17 = smov [#allocation5]   ;;  %s2073_s21 = scalar_lea.hbm %s2876_s1, 1024 }
   0x8   :  { %s42_s18 = sshll.u32 %s2353_s17, 4  ;;  %p2074_p0 = scmp.ne.s32.totalorder %s2876_s1, %s2073_s21  ;;  %s43_s18 = int_to_ptr.vmem [resolvable:$true] %s42_s18 }
   0x9   :  { %p2077_p1 = scmp.lt.u32.totalorder %s2073_s21, %s2876_s1 }
   0xb   :  { %p2079_p2 = pnand %p2077_p1, %p2074_p0 }
   0xd   :  { %2082 = shalt.err (!%p2079_p2)
}
   0xe   :  { %s2083_s26 = scalar_lea.vmem %s43_s18, 1024  ;;  %p2088_p4 = scmp.lt.s32.totalorder %s43_s18, %s43_s18 }
   0xf   :  { %p2084_p3 = scmp.ne.s32.totalorder %s43_s18, %s2083_s26  ;;  %p2089_p5 = scmp.lt.s32.totalorder %s2083_s26, %s2083_s26 }
  0x11   :  { %p2090_p6 = por %p2089_p5, %p2088_p4 }
  0x13   :  { %p2091_p7 = pnand %p2090_p6, %p2084_p3 }
  0x15   :  { %2094 = shalt.err (!%p2091_p7)
}
  0x16   :  { %s2354_s27 = smov 128   ;;  %s2355_s28 = smov 8  }
  0x17   :  { %48 = dma.hbm_to_vmem [thread:$0]  %s2876_s1, 1024, %s43_s18, [#allocation6], %s2354_s27, %s2354_s27, %s2355_s28  }
  0x18   :  { %s2356_s12 = smov [#allocation8]   ;;  %s2357_s14 = smov [#allocation11]  }
  0x19   :  { %s66_s13 = sshll.u32 %s2356_s12, 4  ;;  %s90_s15 = sshll.u32 %s2357_s14, 4  ;;  %s67_s13 = int_to_ptr.vmem [resolvable:$true] %s66_s13  ;;  %s91_s15 = int_to_ptr.vmem [resolvable:$true] %s90_s15 }
  0x1a   :  { %s2095_s19 = scalar_lea.hbm %s2878_s3, 1024 }
  0x1b   :  { %p2096_p8 = scmp.ne.s32.totalorder %s2878_s3, %s2095_s19  ;;  %p2099_p9 = scmp.lt.u32.totalorder %s2095_s19, %s2878_s3 }
  0x1d   :  { %p2101_p10 = pnand %p2099_p9, %p2096_p8 }
  0x1f   :  { %2104 = shalt.err (!%p2101_p10)
}
  0x20   :  { %s2105_s1 = scalar_lea.vmem %s67_s13, 1024  ;;  %p2110_p12 = scmp.lt.s32.totalorder %s67_s13, %s67_s13 }
  0x21   :  { %p2106_p11 = scmp.ne.s32.totalorder %s67_s13, %s2105_s1  ;;  %p2111_p13 = scmp.lt.s32.totalorder %s2105_s1, %s2105_s1 }
  0x23   :  { %p2112_p0 = por %p2111_p13, %p2110_p12 }
  0x25   :  { %p2113_p1 = pnand %p2112_p0, %p2106_p11 }
  0x27   :  { %2116 = shalt.err (!%p2113_p1)
}
  0x28   :  { %72 = dma.hbm_to_vmem [thread:$0]  %s2878_s3, 1024, %s67_s13, [#allocation9], %s2354_s27, %s2354_s27, %s2355_s28  }
  0x29   :  { %s2117_s29 = scalar_lea.hbm %s2880_s5, 512 }
  0x2a   :  { %p2118_p2 = scmp.ne.s32.totalorder %s2880_s5, %s2117_s29  ;;  %p2121_p3 = scmp.lt.u32.totalorder %s2117_s29, %s2880_s5 }
  0x2c   :  { %p2123_p4 = pnand %p2121_p3, %p2118_p2 }
  0x2e   :  { %2126 = shalt.err (!%p2123_p4)
}
  0x2f   :  { %s2127_s17 = scalar_lea.vmem %s91_s15, 512  ;;  %p2132_p6 = scmp.lt.s32.totalorder %s91_s15, %s91_s15 }
  0x30   :  { %p2128_p5 = scmp.ne.s32.totalorder %s91_s15, %s2127_s17  ;;  %p2133_p7 = scmp.lt.s32.totalorder %s2127_s17, %s2127_s17 }
  0x32   :  { %p2134_p8 = por %p2133_p7, %p2132_p6 }
  0x34   :  { %p2135_p9 = pnand %p2134_p8, %p2128_p5 }
  0x36   :  { %2138 = shalt.err (!%p2135_p9)
}
  0x37   :  { %96 = dma.hbm_to_vmem [thread:$0]  %s2880_s5, 512, %s91_s15, [#allocation12], %s2354_s27, %s2354_s27, %s2355_s28  }
  0x38   :  { %s2358_s19 = smov [#allocation14]   ;;  %s2359_s21 = smov [#allocation2]  }
  0x39   :  { %s112_s20 = sshll.u32 %s2358_s19, 4  ;;  %s30_s22 = sshll.u32 %s2359_s21, 4  ;;  %s113_s20 = int_to_ptr.vmem [resolvable:$true] %s112_s20  ;;  %s31_s22 = int_to_ptr.vmem [resolvable:$true] %s30_s22 }
  0x3a   :  { %s2139_s18 = scalar_lea.hbm %s2882_s7, 1024 }
  0x3b   :  { %p2140_p10 = scmp.ne.s32.totalorder %s2882_s7, %s2139_s18  ;;  %p2143_p11 = scmp.lt.u32.totalorder %s2139_s18, %s2882_s7 }
  0x3d   :  { %p2145_p12 = pnand %p2143_p11, %p2140_p10 }
  0x3f   :  { %2148 = shalt.err (!%p2145_p12)
}
  0x40   :  { %s2149_s5 = scalar_lea.vmem %s113_s20, 1024  ;;  %p2154_p0 = scmp.lt.s32.totalorder %s113_s20, %s113_s20 }
  0x41   :  { %p2150_p13 = scmp.ne.s32.totalorder %s113_s20, %s2149_s5  ;;  %p2155_p1 = scmp.lt.s32.totalorder %s2149_s5, %s2149_s5 }
  0x43   :  { %p2156_p2 = por %p2155_p1, %p2154_p0 }
  0x45   :  { %p2157_p3 = pnand %p2156_p2, %p2150_p13 }
  0x47   :  { %2160 = shalt.err (!%p2157_p3)
}
  0x48   :  { %118 = dma.hbm_to_vmem [thread:$0]  %s2882_s7, 1024, %s113_s20, [#allocation15], %s2354_s27, %s2354_s27, %s2355_s28  }
  0x49   :  { %s2161_s16 = scalar_lea.hbm %s2875_s0, 128 }
  0x4a   :  { %p2162_p4 = scmp.ne.s32.totalorder %s2875_s0, %s2161_s16  ;;  %p2165_p5 = scmp.lt.u32.totalorder %s2161_s16, %s2875_s0 }
  0x4c   :  { %p2167_p6 = pnand %p2165_p5, %p2162_p4 }
  0x4e   :  { %2170 = shalt.err (!%p2167_p6)
}
  0x4f   :  { %s2171_s21 = scalar_lea.vmem %s31_s22, 128  ;;  %p2176_p8 = scmp.lt.s32.totalorder %s31_s22, %s31_s22 }
  0x50   :  { %p2172_p7 = scmp.ne.s32.totalorder %s31_s22, %s2171_s21  ;;  %p2177_p9 = scmp.lt.s32.totalorder %s2171_s21, %s2171_s21 }
  0x52   :  { %p2178_p10 = por %p2177_p9, %p2176_p8 }
  0x54   :  { %p2179_p11 = pnand %p2178_p10, %p2172_p7 }
  0x56   :  { %2182 = shalt.err (!%p2179_p11)
}
  0x57   :  { %s2360_s7 = smov 64   ;;  %s2361_s20 = smov 4  }
  0x58   :  { %36 = dma.hbm_to_vmem [thread:$0]  %s2875_s0, 128, %s31_s22, [#allocation3], %s2360_s7, %s2360_s7, %s2361_s20  }
  0x59   :  { %s2362_s18 = smov [#allocation7]   ;;  %s2363_s25 = smov [#allocation10]  }
  0x5a   :  { %s54_s24 = sshll.u32 %s2362_s18, 4  ;;  %s78_s26 = sshll.u32 %s2363_s25, 4  ;;  %s55_s24 = int_to_ptr.vmem [resolvable:$true] %s54_s24  ;;  %s79_s26 = int_to_ptr.vmem [resolvable:$true] %s78_s26 }
  0x5b   :  { %s2183_s15 = scalar_lea.hbm %s2877_s2, 256 }
  0x5c   :  { %p2184_p12 = scmp.ne.s32.totalorder %s2877_s2, %s2183_s15  ;;  %p2187_p13 = scmp.lt.u32.totalorder %s2183_s15, %s2877_s2 }
  0x5e   :  { %p2189_p0 = pnand %p2187_p13, %p2184_p12 }
  0x60   :  { %2192 = shalt.err (!%p2189_p0)
}
  0x61   :  { %s2193_s0 = scalar_lea.vmem %s55_s24, 256  ;;  %p2198_p2 = scmp.lt.s32.totalorder %s55_s24, %s55_s24 }
  0x62   :  { %p2194_p1 = scmp.ne.s32.totalorder %s55_s24, %s2193_s0  ;;  %p2199_p3 = scmp.lt.s32.totalorder %s2193_s0, %s2193_s0 }
  0x64   :  { %p2200_p4 = por %p2199_p3, %p2198_p2 }
  0x66   :  { %p2201_p5 = pnand %p2200_p4, %p2194_p1 }
  0x68   :  { %2204 = shalt.err (!%p2201_p5)
}
  0x69   :  { %60 = dma.hbm_to_vmem [thread:$0]  %s2877_s2, 256, %s55_s24, [#allocation6], %s2354_s27, %s2354_s27, %s2355_s28  }
  0x6a   :  { %s2205_s19 = scalar_lea.hbm %s2879_s4, 1536 }
  0x6b   :  { %p2206_p6 = scmp.ne.s32.totalorder %s2879_s4, %s2205_s19  ;;  %p2209_p7 = scmp.lt.u32.totalorder %s2205_s19, %s2879_s4 }
  0x6d   :  { %p2211_p8 = pnand %p2209_p7, %p2206_p6 }
  0x6f   :  { %2214 = shalt.err (!%p2211_p8)
}
  0x70   :  { %s2215_s25 = scalar_lea.vmem %s79_s26, 1536  ;;  %p2220_p10 = scmp.lt.s32.totalorder %s79_s26, %s79_s26 }
  0x71   :  { %p2216_p9 = scmp.ne.s32.totalorder %s79_s26, %s2215_s25  ;;  %p2221_p11 = scmp.lt.s32.totalorder %s2215_s25, %s2215_s25 }
  0x73   :  { %p2222_p12 = por %p2221_p11, %p2220_p10 }
  0x75   :  { %p2223_p13 = pnand %p2222_p12, %p2216_p9 }
  0x77   :  { %2226 = shalt.err (!%p2223_p13)
}
  0x78   :  { %84 = dma.hbm_to_vmem [thread:$0]  %s2879_s4, 1536, %s79_s26, [#allocation9], %s2354_s27, %s2354_s27, %s2355_s28  }
  0x79   :  { %s2364_s29 = smov [#allocation13]   ;;  %s2365_s15 = smov [#allocation16]  }
  0x7a   :  { %s103_s5 = sshll.u32 %s2364_s29, 4  ;;  %s124_s30 = sshll.u32 %s2365_s15, 4  ;;  %s104_s5 = int_to_ptr.vmem [resolvable:$true] %s103_s5  ;;  %s125_s30 = int_to_ptr.vmem [resolvable:$true] %s124_s30 }
  0x7b   :  { %s2227_s16 = scalar_lea.hbm %s2881_s6, 64 }
  0x7c   :  { %p2228_p0 = scmp.ne.s32.totalorder %s2881_s6, %s2227_s16  ;;  %p2231_p1 = scmp.lt.u32.totalorder %s2227_s16, %s2881_s6 }
  0x7e   :  { %p2233_p2 = pnand %p2231_p1, %p2228_p0 }
  0x80   :  { %2236 = shalt.err (!%p2233_p2)
}
  0x81   :  { %s2237_s4 = scalar_lea.vmem %s104_s5, 64  ;;  %p2242_p4 = scmp.lt.s32.totalorder %s104_s5, %s104_s5 }
  0x82   :  { %p2238_p3 = scmp.ne.s32.totalorder %s104_s5, %s2237_s4  ;;  %p2243_p5 = scmp.lt.s32.totalorder %s2237_s4, %s2237_s4 }
  0x84   :  { %p2244_p6 = por %p2243_p5, %p2242_p4 }
  0x86   :  { %p2245_p7 = pnand %p2244_p6, %p2238_p3 }
  0x88   :  { %2248 = shalt.err (!%p2245_p7)
}
  0x89   :  { %106 = dma.hbm_to_vmem [thread:$0]  %s2881_s6, 64, %s104_s5, [#allocation12]  }
  0x8a   :  { %s2249_s23 = scalar_lea.hbm %s2883_s8, 512 }
  0x8b   :  { %p2250_p8 = scmp.ne.s32.totalorder %s2883_s8, %s2249_s23  ;;  %p2253_p9 = scmp.lt.u32.totalorder %s2249_s23, %s2883_s8 }
  0x8d   :  { %p2255_p10 = pnand %p2253_p9, %p2250_p8 }
  0x8f   :  { %2258 = shalt.err (!%p2255_p10)
}
  0x90   :  { %s2259_s24 = scalar_lea.vmem %s125_s30, 512  ;;  %p2264_p12 = scmp.lt.s32.totalorder %s125_s30, %s125_s30 }
  0x91   :  { %p2260_p11 = scmp.ne.s32.totalorder %s125_s30, %s2259_s24  ;;  %p2265_p13 = scmp.lt.s32.totalorder %s2259_s24, %s2259_s24 }
  0x93   :  { %p2266_p0 = por %p2265_p13, %p2264_p12 }
  0x95   :  { %p2267_p1 = pnand %p2266_p0, %p2260_p11 }
  0x97   :  { %2270 = shalt.err (!%p2267_p1)
}
  0x98   :  { %130 = dma.hbm_to_vmem [thread:$0]  %s2883_s8, 512, %s125_s30, [#allocation15], %s2354_s27, %s2354_s27, %s2355_s28  }
  0x99   :  { %s2366_s5 = smov [#allocation17]   ;;  %s2271_s16 = scalar_lea.hbm %s2884_s9, 64 }
  0x9a   :  { %s137_s15 = sshll.u32 %s2366_s5, 4  ;;  %p2272_p2 = scmp.ne.s32.totalorder %s2884_s9, %s2271_s16  ;;  %s138_s15 = int_to_ptr.vmem [resolvable:$true] %s137_s15 }
  0x9b   :  { %p2275_p3 = scmp.lt.u32.totalorder %s2271_s16, %s2884_s9 }
  0x9d   :  { %p2277_p4 = pnand %p2275_p3, %p2272_p2 }
  0x9f   :  { %2280 = shalt.err (!%p2277_p4)
}
  0xa0   :  { %s2281_s4 = scalar_lea.vmem %s138_s15, 64  ;;  %p2286_p6 = scmp.lt.s32.totalorder %s138_s15, %s138_s15 }
  0xa1   :  { %p2282_p5 = scmp.ne.s32.totalorder %s138_s15, %s2281_s4  ;;  %p2287_p7 = scmp.lt.s32.totalorder %s2281_s4, %s2281_s4 }
  0xa3   :  { %p2288_p8 = por %p2287_p7, %p2286_p6 }
  0xa5   :  { %p2289_p9 = pnand %p2288_p8, %p2282_p5 }
  0xa7   :  { %2292 = shalt.err (!%p2289_p9)
}
  0xa8   :  { %140 = dma.hbm_to_vmem [thread:$0]  %s2884_s9, 64, %s138_s15, [#allocation18]  }
  0xa9   :  { %2337 = dma.done.wait [#allocation3], 128  }
  0xaa   :  { %2338 = vsyncadd [#allocation3], 4294967168 }
  0xab   :  { %2339 = dma.done.wait [#allocation6], 1280  }
  0xac   :  { %2340 = vsyncadd [#allocation6], 4294966016 }
  0xad   :  { %2341 = dma.done.wait [#allocation9], 2560  }
  0xae   :  { %2342 = vsyncadd [#allocation9], 4294964736 }
  0xaf   :  { %2343 = dma.done.wait [#allocation12], 576  }
  0xb0   :  { %2344 = vsyncadd [#allocation12], 4294966720 }
  0xb1   :  { %2345 = dma.done.wait [#allocation15], 1536  }
  0xb2   :  { %2346 = vsyncadd [#allocation15], 4294965760 }
  0xb3   :  { %2347 = dma.done.wait [#allocation18], 64  }
  0xb4   :  { %2348 = vsyncadd [#allocation18], 4294967232  ;;  %vm280_vm0 = vcmask 64512   ;;  %v278_v0 = vld [vmem:[#allocation7] sm:$0xff]  ;;  %v275_v2 = vld [vmem:[#allocation5 + $0x8] sm:$0xff]  ;;  %vm378_vm1 = vcmask 261120  }
  0xb5   :  { %v274_v1 = vld [vmem:[#allocation5] sm:$0xff]  ;;  %1749 = vmatprep.subr.mxu1 %v278_v0  ;;  %v276_v3 = vld [vmem:[#allocation5 + $0x10] sm:$0xff]  ;;  %v277_v4 = vld [vmem:[#allocation5 + $0x18] sm:$0xff]  ;;  %v2367_v8 = vmov 0   ;;  %vm545_vm2 = vcmask 1043456   ;;  %vm508_vm3 = vcmask 31744  }
  0xb6   :  { %1751 = vmatprep.mubr.msk.f32.mxu1 %vm280_vm0, %v274_v1  ;;  %1750 = vmatpush3.msra.mxu1 %v278_v0  ;;  %v2581_v5 = vld [vmem:[#allocation8] sm:$0xff]  ;;  %v202_v7 = vld [vmem:[#allocation14 + $0x30] sm:$0xff]  ;;  %v201_v9 = vld [vmem:[#allocation14 + $0x28] sm:$0xff]  ;;  %vm2369_vm4 = vmmov 0   ;;  %vm946_vm5 = vcmask 60416   ;;  %s2371_s9 = smov [#allocation20]  }
  0xb7   :  { %1752 = vmatmul.mubr.msk.f32.vlgmr.msra.gmra.mrb[0].mxu1 %vm280_vm0, %v275_v2  ;;  %v200_v6 = vld [vmem:[#allocation14 + $0x20] sm:$0xff]  ;;  %1983 = vset.pattern.permute.xlu0 %v2367_v8  ;;  %v203_v10 = vld [vmem:[#allocation14 + $0x38] sm:$0xff]  ;;  %v197_v12 = vld [vmem:[#allocation14 + $0x8] sm:$0xff]  ;;  %s1564_s26 = sshll.u32 %s2371_s9, 4  ;;  %s1565_s26 = int_to_ptr.vmem [resolvable:$true] %s1564_s26 }
  0xb8   :  { %1754 = vmatprep.mubr.msk.f32.mxu1 %vm280_vm0, %v276_v3  ;;  %1984 = vset.pattern.permute.xlu1 %v2367_v8  ;;  %v196_v11 = vld [vmem:[#allocation14] sm:$0xff]  ;;  %v198_v13 = vld [vmem:[#allocation14 + $0x10] sm:$0xff]  ;;  %v199_v14 = vld [vmem:[#allocation14 + $0x18] sm:$0xff]  ;;  %s2293_s13 = scalar_lea.vmem %s1565_s26, 1024  ;;  %p2298_p11 = scmp.lt.s32.totalorder %s1565_s26, %s1565_s26 }
  0xb9   :  { %226 = vperm.xlu0 %1983, %v200_v6   ;;  %236 = vperm.xlu1 %1984, %v202_v7   ;;  %v244_v15 = vld [vmem:[#allocation16] sm:$0xff]  ;;  %v245_v16 = vld [vmem:[#allocation16 + $0x8] sm:$0xff]  ;;  %v246_v17 = vld [vmem:[#allocation16 + $0x10] sm:$0xff]  ;;  %p2294_p10 = scmp.ne.s32.totalorder %s1565_s26, %s2293_s13  ;;  %p2299_p12 = scmp.lt.s32.totalorder %s2293_s13, %s2293_s13 }
  0xba   :  { %v247_v18 = vld [vmem:[#allocation16 + $0x18] sm:$0xff]  ;;  %v268_v19 = vld [vmem:[#allocation17] sm:$0xf]  ;;  %v279_v26 = vld [vmem:[#allocation2] sm:$0xf] }
  0xbb   :  { %1755 = vmatmul.mubr.msk.f32.gmra.mrb[2].mxu1 %vm280_vm0, %v277_v4  ;;  %v2597_v27 = vld [vmem:[#allocation8 + $0x8] sm:$0xff]  ;;  %v2599_v28 = vld [vmem:[#allocation8 + $0x10] sm:$0xff]  ;;  %v2606_v29 = vld [vmem:[#allocation8 + $0x18] sm:$0xff]  ;;  %p2300_p13 = por %p2299_p12, %p2298_p11 }
  0xbc   :  { %1765 = vmatprep.mubr.msk.f32.mxu1 %vm378_vm1, %v2581_v5  ;;  %v2609_v30 = vld [vmem:[#allocation8 + $0x20] sm:$0xff]  ;;  %v2615_v31 = vld [vmem:[#allocation8 + $0x28] sm:$0xff]  ;;  %v2617_v32 = vld [vmem:[#allocation8 + $0x30] sm:$0xff] }
  0xbd   :  { %231 = vperm.xlu0 %1983, %v201_v9   ;;  %241 = vperm.xlu1 %1984, %v203_v10   ;;  %v2623_v33 = vld [vmem:[#allocation8 + $0x38] sm:$0xff]  ;;  %v2625_v34 = vld [vmem:[#allocation10] sm:$0xff]  ;;  %v2631_v35 = vld [vmem:[#allocation10 + $0x8] sm:$0xff]  ;;  %p2301_p0 = pnand %p2300_p13, %p2294_p10 }
  0xbe   :  { %v2633_v36 = vld [vmem:[#allocation10 + $0x10] sm:$0xff]  ;;  %v2639_v37 = vld [vmem:[#allocation10 + $0x18] sm:$0xff]  ;;  %v2641_v38 = vld [vmem:[#allocation10 + $0x20] sm:$0xff] }
  0xbf   :  { %v2647_v39 = vld [vmem:[#allocation10 + $0x28] sm:$0xff]  ;;  %v2649_v40 = vld [vmem:[#allocation10 + $0x30] sm:$0xff]  ;;  %v2655_v41 = vld [vmem:[#allocation10 + $0x38] sm:$0xff] }
  0xc0   :  { %v2659_v42 = vld [vmem:[#allocation10 + $0x40] sm:$0xff]  ;;  %v2661_v43 = vld [vmem:[#allocation10 + $0x48] sm:$0xff]  ;;  %v2667_v44 = vld [vmem:[#allocation10 + $0x50] sm:$0xff] }
  0xc1   :  { %206 = vperm.xlu0 %1983, %v196_v11   ;;  %211 = vperm.xlu1 %1984, %v197_v12   ;;  %v2669_v45 = vld [vmem:[#allocation10 + $0x58] sm:$0xff]  ;;  %v2675_v46 = vld [vmem:[#allocation11] sm:$0xff] }
  0xc5   :  { %216 = vperm.xlu0 %1983, %v198_v13   ;;  %221 = vperm.xlu1 %1984, %v199_v14  }
  0xc9   :  { %250 = vperm.xlu0 %1983, %v244_v15   ;;  %255 = vperm.xlu1 %1984, %v245_v16  }
  0xcd   :  { %260 = vperm.xlu0 %1983, %v246_v17   ;;  %265 = vperm.xlu1 %1984, %v247_v18  }
  0xd1   :  { %271 = vperm.xlu0 %1983, %v268_v19  }
 0x138   :  { %v2679_v47 = vpop.permute.xlu1 %236  ;;  %v2681_v48 = vpop.permute.xlu0 %226 }
 0x13c   :  { %v2683_v49 = vpop.permute.xlu1 %241  ;;  %v2685_v50 = vpop.permute.xlu0 %231 }
 0x140   :  { %v2687_v51 = vpop.permute.xlu1 %211  ;;  %v2689_v52 = vpop.permute.xlu0 %206 }
 0x144   :  { %v2693_v58 = vpop.permute.xlu1 %221  ;;  %v2695_v61 = vpop.permute.xlu0 %216 }
 0x18a   :  { %v2585_v20 = vpop.f32.mrb[0].mxu1 }
 0x18b   :  { %v2587_v21 = vpop.f32.mrb[1].mxu1 }
 0x18c   :  { %v1895_v22 = vpack.c.bf16 %v2585_v20, %v2587_v21 }
 0x18e   :  { %v2591_v23 = vpop.f32.mrb[2].mxu1  ;;  %1896 = vmatprep.subr.bf16.mxu1 %v1895_v22 }
 0x18f   :  { %v2593_v24 = vpop.f32.mrb[3].mxu1  ;;  %1898 = vmatpush3.bf16.msra.mxu1 %v1895_v22 }
 0x190   :  { %v1899_v25 = vpack.c.bf16 %v2591_v23, %v2593_v24 }
 0x192   :  { %1900 = vmatprep.subr.bf16.mxu1 %v1899_v25 }
 0x193   :  { %1902 = vmatpush3.bf16.msra.mxu1 %v1899_v25 }
 0x194   :  { %1777 = vmatprep.subr.msk.mxu1 %vm545_vm2, %v279_v26 }
 0x196   :  { %1766 = vmatmul.mubr.msk.f32.vlgmr.msra.gmra.mrb[4].mxu1 %vm378_vm1, %v2597_v27 }
 0x197   :  { %1768 = vmatprep.mubr.msk.f32.mxu1 %vm378_vm1, %v2599_v28  ;;  %1778 = vmatpush3.msk.msra.mxu1 %vm545_vm2, %v279_v26 }
 0x19a   :  { %1769 = vmatmul.mubr.msk.f32.gmra.mrb[6].mxu1 %vm378_vm1, %v2606_v29 }
 0x19b   :  { %1771 = vmatprep.mubr.msk.f32.mxu1 %vm378_vm1, %v2609_v30 }
 0x19e   :  { %1772 = vmatmul.mubr.msk.f32.gmra.mrb[8].mxu1 %vm378_vm1, %v2615_v31 }
 0x19f   :  { %1774 = vmatprep.mubr.msk.f32.mxu1 %vm378_vm1, %v2617_v32 }
 0x1a2   :  { %1775 = vmatmul.mubr.msk.f32.gmra.mrb[10].mxu1 %vm378_vm1, %v2623_v33 }
 0x1a3   :  { %1779 = vmatprep.mubr.msk.f32.mxu1 %vm508_vm3, %v2625_v34 }
 0x1a6   :  { %1780 = vmatmul.mubr.msk.f32.vlgmr.msra.gmra.mrb[4].mxu1 %vm508_vm3, %v2631_v35 }
 0x1a7   :  { %1782 = vmatprep.mubr.msk.f32.mxu1 %vm508_vm3, %v2633_v36 }
 0x1aa   :  { %1783 = vmatmul.mubr.msk.f32.gmra.mrb[6].mxu1 %vm508_vm3, %v2639_v37 }
 0x1ab   :  { %1785 = vmatprep.mubr.msk.f32.mxu1 %vm508_vm3, %v2641_v38 }
 0x1ae   :  { %1786 = vmatmul.mubr.msk.f32.gmra.mrb[8].mxu1 %vm508_vm3, %v2647_v39 }
 0x1af   :  { %1788 = vmatprep.mubr.msk.f32.mxu1 %vm508_vm3, %v2649_v40 }
 0x1b2   :  { %1789 = vmatmul.mubr.msk.f32.gmra.mrb[10].mxu1 %vm508_vm3, %v2655_v41 }
 0x1b3   :  { %1791 = vmatprep.mubr.msk.f32.mxu1 %vm508_vm3, %v2659_v42 }
 0x1b6   :  { %1792 = vmatmul.mubr.msk.f32.gmra.mrb[12].mxu1 %vm508_vm3, %v2661_v43 }
 0x1b7   :  { %1794 = vmatprep.mubr.msk.f32.mxu1 %vm508_vm3, %v2667_v44 }
 0x1ba   :  { %1795 = vmatmul.mubr.msk.f32.gmra.mrb[14].mxu1 %vm508_vm3, %v2669_v45 }
 0x1bb   :  { %1805 = vmatprep.mubr.msk.f32.mxu1 %vm378_vm1, %v2675_v46 }
 0x279   :  { %v1781_v53 = vpop.f32.mrb[4].mxu1 }
 0x27a   :  { %v679_v54 = vadd.f32 %v1781_v53, %v2687_v51  ;;  %v615_v55 = vpop.f32.mrb[5].mxu1 }
 0x27b   :  { %v678_v56 = vadd.f32 %v615_v55, %v2689_v52 }
 0x27c   :  { %v1611_v57 = vmul.f32 -1.442695, %v679_v54 }
 0x27d   :  { %v1610_v59 = vmul.f32 -1.442695, %v678_v56  ;;  %v1784_v60 = vpop.f32.mrb[6].mxu1 }
 0x27e   :  { %1985 = vpow2.f32 %v1611_v57  ;;  %v681_v62 = vadd.f32 %v1784_v60, %v2693_v58  ;;  %v625_v63 = vpop.f32.mrb[7].mxu1 }
 0x27f   :  { %1987 = vpow2.f32 %v1610_v59  ;;  %v680_v0 = vadd.f32 %v625_v63, %v2695_v61 }
 0x280   :  { %v1613_v1 = vmul.f32 -1.442695, %v681_v62 }
 0x281   :  { %v1612_v2 = vmul.f32 -1.442695, %v680_v0  ;;  %v1787_v3 = vpop.f32.mrb[8].mxu1 }
 0x282   :  { %1989 = vpow2.f32 %v1613_v1  ;;  %v711_v4 = vadd.f32 %v1787_v3, %v2685_v50  ;;  %v635_v6 = vpop.f32.mrb[9].mxu1 }
 0x283   :  { %1991 = vpow2.f32 %v1612_v2  ;;  %v710_v7 = vadd.f32 %v635_v6, %v2681_v48 }
 0x284   :  { %v1615_v8 = vmul.f32 -1.442695, %v711_v4 }
 0x285   :  { %v1614_v9 = vmul.f32 -1.442695, %v710_v7  ;;  %v1790_v10 = vpop.f32.mrb[10].mxu1 }
 0x286   :  { %1993 = vpow2.f32 %v1615_v8  ;;  %v713_v11 = vadd.f32 %v1790_v10, %v2683_v49  ;;  %v645_v12 = vpop.f32.mrb[11].mxu1 }
 0x287   :  { %1995 = vpow2.f32 %v1614_v9  ;;  %v712_v13 = vadd.f32 %v645_v12, %v2679_v47 }
 0x288   :  { %v1986_v14 = vpop.eup %1985  ;;  %v1617_v15 = vmul.f32 -1.442695, %v713_v11 }
 0x289   :  { %v1988_v16 = vpop.eup %1987  ;;  %v695_v17 = vadd.f32 1.0, %v1986_v14  ;;  %v1616_v18 = vmul.f32 -1.442695, %v712_v13 }
 0x28a   :  { %v694_v19 = vadd.f32 1.0, %v1988_v16  ;;  %1997 = vpow2.f32 %v1617_v15 }
 0x28b   :  { %1999 = vrcp.f32 %v695_v17 }
 0x28c   :  { %v1990_v22 = vpop.eup %1989  ;;  %2001 = vrcp.f32 %v694_v19 }
 0x28d   :  { %v1992_v25 = vpop.eup %1991  ;;  %v697_v26 = vadd.f32 1.0, %v1990_v22  ;;  %2003 = vpow2.f32 %v1616_v18 }
 0x28e   :  { %v696_v53 = vadd.f32 1.0, %v1992_v25 }
 0x28f   :  { %2005 = vrcp.f32 %v697_v26 }
 0x290   :  { %v1994_v54 = vpop.eup %1993  ;;  %2007 = vrcp.f32 %v696_v53  ;;  %v2711_v53 = vld [vmem:[#allocation11 + $0x8] sm:$0xff] }
 0x291   :  { %v1996_v55 = vpop.eup %1995  ;;  %v727_v56 = vadd.f32 1.0, %v1994_v54  ;;  %v2713_v54 = vld [vmem:[#allocation11 + $0x10] sm:$0xff] }
 0x292   :  { %v726_v57 = vadd.f32 1.0, %v1996_v55  ;;  %v2727_v55 = vpop.permute.xlu0 %250 }
 0x293   :  { %2009 = vrcp.f32 %v727_v56 }
 0x294   :  { %v1998_v59 = vpop.eup %1997  ;;  %2011 = vrcp.f32 %v726_v57 }
 0x295   :  { %v2000_v60 = vpop.eup %1999  ;;  %v729_v62 = vadd.f32 1.0, %v1998_v59 }
 0x296   :  { %v2002_v63 = vpop.eup %2001  ;;  %v848_v0 = vsub.f32 1.0, %v2000_v60 }
 0x297   :  { %v2004_v1 = vpop.eup %2003  ;;  %2013 = vrcp.f32 %v729_v62  ;;  %v847_v2 = vsub.f32 1.0, %v2002_v63 }
 0x298   :  { %v728_v3 = vadd.f32 1.0, %v2004_v1  ;;  %v852_v4 = vmul.f32 %v2585_v20, %v848_v0 }
 0x299   :  { %v2006_v6 = vpop.eup %2005  ;;  %v851_v7 = vmul.f32 %v847_v2, %v2587_v21  ;;  %v2733_v2 = vpop.permute.xlu0 %260 }
 0x29a   :  { %v2008_v8 = vpop.eup %2007  ;;  %2015 = vrcp.f32 %v728_v3  ;;  %v850_v9 = vsub.f32 1.0, %v2006_v6 }
 0x29b   :  { %v849_v10 = vsub.f32 1.0, %v2008_v8 }
 0x29c   :  { %v854_v11 = vmul.f32 %v2591_v23, %v850_v9 }
 0x29d   :  { %v2010_v12 = vpop.eup %2009  ;;  %v853_v13 = vmul.f32 %v849_v10, %v2593_v24 }
 0x29e   :  { %v2012_v14 = vpop.eup %2011  ;;  %v739_v15 = vmul.f32 %v2010_v12, %v2585_v20  ;;  %v2719_v20 = vld [vmem:[#allocation11 + $0x18] sm:$0xff] }
 0x29f   :  { %v738_v16 = vmul.f32 %v2012_v14, %v2587_v21  ;;  %v2368_v21 = vmov 0.0|0.0  }
 0x2a0   :  { %1911 = vmatprep.subr.bf16.mxu0 %v2368_v21 }
 0x2a1   :  { %v2014_v17 = vpop.eup %2013  ;;  %v1903_v18 = vpack.c.bf16 %v739_v15, %v738_v16 }
 0x2a2   :  { %v741_v19 = vmul.f32 %v2014_v17, %v2591_v23  ;;  %v2370_v23 = vmov 0.0  }
 0x2a3   :  { %1904 = vmatprep.subr.bf16.mxu1 %v1903_v18  ;;  %1819 = vmatprep.mubr.msk.f32.mxu0 %vm2369_vm4, %v2370_v23 }
 0x2a4   :  { %v2016_v22 = vpop.eup %2015  ;;  %1906 = vmatpush3.bf16.msra.mxu1 %v1903_v18 }
 0x2a5   :  { %v740_v25 = vmul.f32 %v2016_v22, %v2593_v24  ;;  %v2725_v24 = vpop.permute.xlu1 %255 }
 0x2a7   :  { %v1907_v26 = vpack.c.bf16 %v741_v19, %v740_v25 }
 0x2a9   :  { %1908 = vmatprep.subr.bf16.mxu1 %v1907_v26  ;;  %v2731_v0 = vpop.permute.xlu1 %265 }
 0x2aa   :  { %1910 = vmatpush3.bf16.msra.mxu1 %v1907_v26 }
 0x2ab   :  { %1933 = vmatprep.subr.bf16.mxu1 %v2368_v21 }
 0x2ad   :  { %1806 = vmatmul.mubr.msk.f32.vlgmr.msra.gmra.mrb[12].mxu1 %vm378_vm1, %v2711_v53 }
 0x2ae   :  { %1808 = vmatprep.mubr.msk.f32.mxu1 %vm378_vm1, %v2713_v54 }
 0x2b1   :  { %1809 = vmatmul.mubr.msk.f32.gmra.mrb[14].mxu1 %vm378_vm1, %v2719_v20 }
 0x2b2   :  { %1892 = vmatprep.mubr.msk.f32.mxu1 %vm2369_vm4, %v2370_v23 }
 0x380   :  { %v1807_v56 = vpop.f32.mrb[12].mxu1 }
 0x381   :  { %v840_v57 = vadd.f32 %v1807_v56, %v2725_v24  ;;  %v820_v59 = vpop.f32.mrb[13].mxu1 }
 0x382   :  { %v839_v62 = vadd.f32 %v820_v59, %v2727_v55 }
 0x383   :  { %2017 = vtanh.f32 %v840_v57 }
 0x384   :  { %2019 = vtanh.f32 %v839_v62  ;;  %v1810_v1 = vpop.f32.mrb[14].mxu1 }
 0x385   :  { %v842_v3 = vadd.f32 %v1810_v1, %v2731_v0  ;;  %v830_v9 = vpop.f32.mrb[15].mxu1 }
 0x386   :  { %v841_v10 = vadd.f32 %v830_v9, %v2733_v2 }
 0x387   :  { %2021 = vtanh.f32 %v842_v3 }
 0x388   :  { %2023 = vtanh.f32 %v841_v10 }
 0x38d   :  { %v2018_v12 = vpop.eup %2017 }
 0x38e   :  { %v2020_v14 = vpop.eup %2019  ;;  %v856_v15 = vmul.f32 %v2018_v12, %v2000_v60 }
 0x38f   :  { %v855_v16 = vmul.f32 %v2020_v14, %v2002_v63  ;;  %v954_v63 = vld [vmem:[#allocation7 + $0x8] sm:$0xff] }
 0x390   :  { %v860_v17 = vadd.f32 %v856_v15, %v852_v4  ;;  %v2742_v4 = vld [vmem:[#allocation13] sm:$0xf] }
 0x391   :  { %v2022_v18 = vpop.eup %2021  ;;  %v859_v19 = vadd.f32 %v855_v16, %v851_v7  ;;  %v950_v7 = vld [vmem:[#allocation5 + $0x28] sm:$0xff]  ;;  %v956_v16 = vld [vmem:[#allocation2 + $0x4] sm:$0xf] }
 0x392   :  { %v2024_v22 = vpop.eup %2023  ;;  %943 = vst.msk [vmem:[#allocation20 + $0x8] sm:$0xff] %vm280_vm0, %v860_v17  ;;  %v858_v25 = vmul.f32 %v2022_v18, %v2006_v6  ;;  %v949_v6 = vld [vmem:[#allocation5 + $0x20] sm:$0xff] }
 0x393   :  { %v1912_v26 = vpack.c.bf16 %v860_v17, %v859_v19  ;;  %942 = vst.msk [vmem:[#allocation20] sm:$0xff] %vm280_vm0, %v859_v19  ;;  %v857_v23 = vmul.f32 %v2024_v22, %v2008_v8  ;;  %v951_v8 = vld [vmem:[#allocation5 + $0x30] sm:$0xff] }
 0x394   :  { %v862_v56 = vadd.f32 %v858_v25, %v854_v11  ;;  %v952_v11 = vld [vmem:[#allocation5 + $0x38] sm:$0xff] }
 0x395   :  { %1913 = vmatpush3.bf16.msra.mxu0 %v1912_v26  ;;  %v861_v57 = vadd.f32 %v857_v23, %v853_v13  ;;  %v2752_v13 = vpop.permute.xlu0 %271 }
 0x396   :  { %1914 = vmatprep.subr.bf16.mxu0 %v2368_v21  ;;  %945 = vst.msk [vmem:[#allocation20 + $0x18] sm:$0xff] %vm280_vm0, %v862_v56 }
 0x397   :  { %v1915_v60 = vpack.c.bf16 %v862_v56, %v861_v57  ;;  %944 = vst.msk [vmem:[#allocation20 + $0x10] sm:$0xff] %vm280_vm0, %v861_v57 }
 0x399   :  { %1916 = vmatpush3.bf16.msra.mxu0 %v1915_v60 }
 0x39a   :  { %1822 = vmatprep.subr.mxu0 %v954_v63 }
 0x39c   :  { %1820 = vmatmul.mubr.msk.f32.vlgmr.msra.gmra.mrb[0].mxu0 %vm378_vm1, %v2742_v4 }
 0x39d   :  { %1823 = vmatpush3.msra.mxu0 %v954_v63  ;;  %1824 = vmatprep.mubr.msk.f32.mxu0 %vm280_vm0, %v949_v6 }
 0x3a0   :  { %1825 = vmatmul.mubr.msk.f32.vlgmr.msra.gmra.mrb[2].mxu0 %vm280_vm0, %v950_v7 }
 0x3a1   :  { %1827 = vmatprep.mubr.msk.f32.mxu0 %vm280_vm0, %v951_v8 }
 0x3a4   :  { %1828 = vmatmul.mubr.msk.f32.gmra.mrb[4].mxu0 %vm280_vm0, %v952_v11 }
 0x3a5   :  { %1838 = vmatprep.mubr.msk.f32.mxu0 %vm378_vm1, %v2581_v5 }
 0x46f   :  { %v932_v59 = vpop.f32.mrb[0].mxu0 }
 0x470   :  { %v933_v62 = vadd.f32 %v932_v59, %v2752_v13  ;;  %v1821_v1 = vpop.f32.mrb[1].mxu0 }
 0x472   :  { %v1623_v3 = vmul.f32 -1.442695, %v933_v62 }
 0x473   :  { %v2755_v9 = vpop.f32.mrb[2].mxu0 }
 0x474   :  { %2025 = vpow2.f32 %v1623_v3  ;;  %v2757_v10 = vpop.f32.mrb[3].mxu0 }
 0x475   :  { %v1917_v12 = vpack.c.bf16 %v2755_v9, %v2757_v10 }
 0x477   :  { %v2761_v14 = vpop.f32.mrb[4].mxu0  ;;  %1918 = vmatprep.subr.bf16.mxu0 %v1917_v12 }
 0x478   :  { %v2763_v15 = vpop.f32.mrb[5].mxu0  ;;  %1920 = vmatpush3.bf16.msra.mxu0 %v1917_v12 }
 0x479   :  { %v1921_v5 = vpack.c.bf16 %v2761_v14, %v2763_v15 }
 0x47b   :  { %1922 = vmatprep.subr.bf16.mxu0 %v1921_v5 }
 0x47c   :  { %1924 = vmatpush3.bf16.msra.mxu0 %v1921_v5 }
 0x47d   :  { %1850 = vmatprep.subr.msk.mxu0 %vm545_vm2, %v956_v16 }
 0x47e   :  { %v2026_v17 = vpop.eup %2025 }
 0x47f   :  { %v939_v18 = vadd.f32 1.0, %v2026_v17  ;;  %1839 = vmatmul.mubr.msk.f32.vlgmr.msra.gmra.mrb[6].mxu0 %vm378_vm1, %v2597_v27 }
 0x480   :  { %1841 = vmatprep.mubr.msk.f32.mxu0 %vm378_vm1, %v2599_v28  ;;  %1851 = vmatpush3.msk.msra.mxu0 %vm545_vm2, %v956_v16 }
 0x481   :  { %2027 = vrcp.f32 %v939_v18 }
 0x483   :  { %1842 = vmatmul.mubr.msk.f32.gmra.mrb[8].mxu0 %vm378_vm1, %v2606_v29 }
 0x484   :  { %1844 = vmatprep.mubr.msk.f32.mxu0 %vm378_vm1, %v2609_v30 }
 0x487   :  { %1845 = vmatmul.mubr.msk.f32.gmra.mrb[10].mxu0 %vm378_vm1, %v2615_v31 }
 0x488   :  { %1847 = vmatprep.mubr.msk.f32.mxu0 %vm378_vm1, %v2617_v32 }
 0x48b   :  { %v2028_v27 = vpop.eup %2027  ;;  %1848 = vmatmul.mubr.msk.f32.gmra.mrb[12].mxu0 %vm378_vm1, %v2623_v33 }
 0x48c   :  { %1852 = vmatprep.mubr.msk.f32.mxu0 %vm508_vm3, %v2625_v34  ;;  %947 = vst.msk [vmem:[#allocation19] sm:$0xf] %vm946_vm5, %v2028_v27 }
 0x48f   :  { %1853 = vmatmul.mubr.msk.f32.vlgmr.msra.gmra.mrb[6].mxu0 %vm508_vm3, %v2631_v35 }
 0x490   :  { %1855 = vmatprep.mubr.msk.f32.mxu0 %vm508_vm3, %v2633_v36 }
 0x493   :  { %1856 = vmatmul.mubr.msk.f32.gmra.mrb[8].mxu0 %vm508_vm3, %v2639_v37 }
 0x494   :  { %1858 = vmatprep.mubr.msk.f32.mxu0 %vm508_vm3, %v2641_v38 }
 0x497   :  { %1859 = vmatmul.mubr.msk.f32.gmra.mrb[10].mxu0 %vm508_vm3, %v2647_v39 }
 0x498   :  { %1861 = vmatprep.mubr.msk.f32.mxu0 %vm508_vm3, %v2649_v40 }
 0x49b   :  { %1862 = vmatmul.mubr.msk.f32.gmra.mrb[12].mxu0 %vm508_vm3, %v2655_v41 }
 0x49c   :  { %1864 = vmatprep.mubr.msk.f32.mxu0 %vm508_vm3, %v2659_v42 }
 0x49f   :  { %1865 = vmatmul.mubr.msk.f32.gmra.mrb[14].mxu0 %vm508_vm3, %v2661_v43 }
 0x4a0   :  { %1867 = vmatprep.mubr.msk.f32.mxu0 %vm508_vm3, %v2667_v44 }
 0x4a3   :  { %1868 = vmatmul.mubr.msk.f32.gmra.mrb[16].mxu0 %vm508_vm3, %v2669_v45 }
 0x4a4   :  { %1878 = vmatprep.mubr.msk.f32.mxu0 %vm378_vm1, %v2675_v46 }
 0x562   :  { %v1854_v28 = vpop.f32.mrb[6].mxu0 }
 0x563   :  { %v1292_v29 = vadd.f32 %v1854_v28, %v2687_v51  ;;  %v1228_v30 = vpop.f32.mrb[7].mxu0 }
 0x564   :  { %v1291_v31 = vadd.f32 %v1228_v30, %v2689_v52 }
 0x565   :  { %v1650_v32 = vmul.f32 -1.442695, %v1292_v29 }
 0x566   :  { %v1649_v33 = vmul.f32 -1.442695, %v1291_v31  ;;  %v1857_v34 = vpop.f32.mrb[8].mxu0 }
 0x567   :  { %2029 = vpow2.f32 %v1650_v32  ;;  %v1294_v35 = vadd.f32 %v1857_v34, %v2693_v58  ;;  %v1238_v36 = vpop.f32.mrb[9].mxu0 }
 0x568   :  { %2031 = vpow2.f32 %v1649_v33  ;;  %v1293_v37 = vadd.f32 %v1238_v36, %v2695_v61 }
 0x569   :  { %v1652_v38 = vmul.f32 -1.442695, %v1294_v35 }
 0x56a   :  { %v1651_v39 = vmul.f32 -1.442695, %v1293_v37  ;;  %v1860_v40 = vpop.f32.mrb[10].mxu0 }
 0x56b   :  { %2033 = vpow2.f32 %v1652_v38  ;;  %v1324_v41 = vadd.f32 %v1860_v40, %v2685_v50  ;;  %v1248_v42 = vpop.f32.mrb[11].mxu0 }
 0x56c   :  { %2035 = vpow2.f32 %v1651_v39  ;;  %v1323_v43 = vadd.f32 %v1248_v42, %v2681_v48 }
 0x56d   :  { %v1654_v44 = vmul.f32 -1.442695, %v1324_v41 }
 0x56e   :  { %v1653_v45 = vmul.f32 -1.442695, %v1323_v43  ;;  %v1863_v46 = vpop.f32.mrb[12].mxu0 }
 0x56f   :  { %2037 = vpow2.f32 %v1654_v44  ;;  %v1326_v51 = vadd.f32 %v1863_v46, %v2683_v49  ;;  %v1258_v52 = vpop.f32.mrb[13].mxu0 }
 0x570   :  { %2039 = vpow2.f32 %v1653_v45  ;;  %v1325_v58 = vadd.f32 %v1258_v52, %v2679_v47 }
 0x571   :  { %v2030_v61 = vpop.eup %2029  ;;  %v1656_v19 = vmul.f32 -1.442695, %v1326_v51 }
 0x572   :  { %v2032_v22 = vpop.eup %2031  ;;  %v1308_v25 = vadd.f32 1.0, %v2030_v61  ;;  %v1655_v26 = vmul.f32 -1.442695, %v1325_v58 }
 0x573   :  { %v1307_v50 = vadd.f32 1.0, %v2032_v22  ;;  %2041 = vpow2.f32 %v1656_v19 }
 0x574   :  { %2043 = vrcp.f32 %v1308_v25 }
 0x575   :  { %v2034_v23 = vpop.eup %2033  ;;  %2045 = vrcp.f32 %v1307_v50 }
 0x576   :  { %v2036_v48 = vpop.eup %2035  ;;  %v1310_v56 = vadd.f32 1.0, %v2034_v23  ;;  %2047 = vpow2.f32 %v1655_v26 }
 0x577   :  { %v1309_v57 = vadd.f32 1.0, %v2036_v48 }
 0x578   :  { %2049 = vrcp.f32 %v1310_v56 }
 0x579   :  { %v2038_v49 = vpop.eup %2037  ;;  %2051 = vrcp.f32 %v1309_v57 }
 0x57a   :  { %v2040_v60 = vpop.eup %2039  ;;  %v1340_v63 = vadd.f32 1.0, %v2038_v49 }
 0x57b   :  { %v1339_v47 = vadd.f32 1.0, %v2040_v60 }
 0x57c   :  { %2053 = vrcp.f32 %v1340_v63 }
 0x57d   :  { %v2042_v6 = vpop.eup %2041  ;;  %2055 = vrcp.f32 %v1339_v47 }
 0x57e   :  { %v2044_v7 = vpop.eup %2043  ;;  %v1342_v8 = vadd.f32 1.0, %v2042_v6 }
 0x57f   :  { %v2046_v11 = vpop.eup %2045  ;;  %v1449_v59 = vsub.f32 1.0, %v2044_v7 }
 0x580   :  { %v2048_v62 = vpop.eup %2047  ;;  %2057 = vrcp.f32 %v1342_v8  ;;  %v1448_v1 = vsub.f32 1.0, %v2046_v11 }
 0x581   :  { %v1341_v3 = vadd.f32 1.0, %v2048_v62  ;;  %v1453_v12 = vmul.f32 %v2755_v9, %v1449_v59 }
 0x582   :  { %v2050_v5 = vpop.eup %2049  ;;  %v1452_v16 = vmul.f32 %v1448_v1, %v2757_v10 }
 0x583   :  { %v2052_v17 = vpop.eup %2051  ;;  %2059 = vrcp.f32 %v1341_v3  ;;  %v1451_v18 = vsub.f32 1.0, %v2050_v5 }
 0x584   :  { %v1450_v27 = vsub.f32 1.0, %v2052_v17 }
 0x585   :  { %v1455_v28 = vmul.f32 %v2761_v14, %v1451_v18 }
 0x586   :  { %v2054_v29 = vpop.eup %2053  ;;  %v1454_v30 = vmul.f32 %v1450_v27, %v2763_v15 }
 0x587   :  { %v2056_v31 = vpop.eup %2055  ;;  %v1352_v32 = vmul.f32 %v2054_v29, %v2755_v9 }
 0x588   :  { %v1351_v33 = vmul.f32 %v2056_v31, %v2757_v10 }
 0x58a   :  { %v2058_v34 = vpop.eup %2057  ;;  %v1925_v35 = vpack.c.bf16 %v1352_v32, %v1351_v33 }
 0x58b   :  { %v1354_v36 = vmul.f32 %v2058_v34, %v2761_v14 }
 0x58c   :  { %1926 = vmatprep.subr.bf16.mxu0 %v1925_v35 }
 0x58d   :  { %v2060_v37 = vpop.eup %2059  ;;  %1928 = vmatpush3.bf16.msra.mxu0 %v1925_v35 }
 0x58e   :  { %v1353_v38 = vmul.f32 %v2060_v37, %v2763_v15 }
 0x590   :  { %v1929_v39 = vpack.c.bf16 %v1354_v36, %v1353_v38 }
 0x592   :  { %1930 = vmatprep.subr.bf16.mxu0 %v1929_v39 }
 0x593   :  { %1932 = vmatpush3.bf16.msra.mxu0 %v1929_v39 }
 0x596   :  { %1879 = vmatmul.mubr.msk.f32.vlgmr.msra.gmra.mrb[14].mxu0 %vm378_vm1, %v2711_v53 }
 0x597   :  { %1881 = vmatprep.mubr.msk.f32.mxu0 %vm378_vm1, %v2713_v54 }
 0x59a   :  { %1882 = vmatmul.mubr.msk.f32.gmra.mrb[16].mxu0 %vm378_vm1, %v2719_v20 }
 0x669   :  { %v1880_v9 = vpop.f32.mrb[14].mxu0 }
 0x66a   :  { %v1441_v10 = vadd.f32 %v1880_v9, %v2725_v24  ;;  %v1421_v14 = vpop.f32.mrb[15].mxu0 }
 0x66b   :  { %v1440_v40 = vadd.f32 %v1421_v14, %v2727_v55 }
 0x66c   :  { %2061 = vtanh.f32 %v1441_v10 }
 0x66d   :  { %2063 = vtanh.f32 %v1440_v40  ;;  %v1883_v15 = vpop.f32.mrb[16].mxu0 }
 0x66e   :  { %v1443_v41 = vadd.f32 %v1883_v15, %v2731_v0  ;;  %v1431_v42 = vpop.f32.mrb[17].mxu0 }
 0x66f   :  { %v1442_v53 = vadd.f32 %v1431_v42, %v2733_v2 }
 0x670   :  { %2065 = vtanh.f32 %v1443_v41 }
 0x671   :  { %2067 = vtanh.f32 %v1442_v53 }
 0x676   :  { %v2062_v54 = vpop.eup %2061 }
 0x677   :  { %v2064_v43 = vpop.eup %2063  ;;  %v1457_v44 = vmul.f32 %v2062_v54, %v2044_v7 }
 0x678   :  { %v1456_v20 = vmul.f32 %v2064_v43, %v2046_v11 }
 0x679   :  { %v1461_v45 = vadd.f32 %v1457_v44, %v1453_v12 }
 0x67a   :  { %v2066_v46 = vpop.eup %2065  ;;  %v1460_v24 = vadd.f32 %v1456_v20, %v1452_v16 }
 0x67b   :  { %v2068_v51 = vpop.eup %2067  ;;  %1542 = vst.msk [vmem:[#allocation20 + $0x28] sm:$0xff] %vm280_vm0, %v1461_v45  ;;  %v1459_v55 = vmul.f32 %v2066_v46, %v2050_v5 }
 0x67c   :  { %v1934_v52 = vpack.c.bf16 %v1461_v45, %v1460_v24  ;;  %1541 = vst.msk [vmem:[#allocation20 + $0x20] sm:$0xff] %vm280_vm0, %v1460_v24  ;;  %v1458_v0 = vmul.f32 %v2068_v51, %v2052_v17 }
 0x67d   :  { %v1463_v58 = vadd.f32 %v1459_v55, %v1455_v28 }
 0x67e   :  { %1935 = vmatpush3.bf16.msra.mxu1 %v1934_v52  ;;  %v1462_v2 = vadd.f32 %v1458_v0, %v1454_v30 }
 0x67f   :  { %1936 = vmatprep.subr.bf16.mxu1 %v2368_v21  ;;  %1544 = vst.msk [vmem:[#allocation20 + $0x38] sm:$0xff] %vm280_vm0, %v1463_v58 }
 0x680   :  { %v1937_v61 = vpack.c.bf16 %v1463_v58, %v1462_v2  ;;  %1543 = vst.msk [vmem:[#allocation20 + $0x30] sm:$0xff] %vm280_vm0, %v1462_v2 }
 0x682   :  { %1938 = vmatpush3.bf16.msra.mxu1 %v1937_v61 }
 0x685   :  { %1893 = vmatmul.mubr.msk.f32.vlgmr.msra.gmra.mrb[16].mxu1 %vm378_vm1, %v2742_v4 }
 0x686   :  { %2304 = shalt.err (!%p2301_p0)
}
 0x687   :  { %s2305_s23 = scalar_lea.hbm %s2886_s11, 1024 }
 0x688   :  { %p2306_p1 = scmp.ne.s32.totalorder %s2886_s11, %s2305_s23  ;;  %p2309_p2 = scmp.lt.u32.totalorder %s2305_s23, %s2886_s11 }
 0x68a   :  { %p2311_p3 = pnand %p2309_p2, %p2306_p1 }
 0x68c   :  { %2314 = shalt.err (!%p2311_p3)
}
 0x68d   :  { %1570 = dma.vmem_to_hbm [thread:$0]  %s1565_s26, 1024, %s2886_s11, [#allocation21], %s2354_s27, %s2354_s27, %s2355_s28  }
 0x68e   :  { %s2372_s29 = smov [#allocation19]  }
 0x68f   :  { %s1552_s5 = sshll.u32 %s2372_s29, 4  ;;  %s1553_s5 = int_to_ptr.vmem [resolvable:$true] %s1552_s5 }
 0x690   :  { %s2315_s15 = scalar_lea.vmem %s1553_s5, 128  ;;  %p2320_p5 = scmp.lt.s32.totalorder %s1553_s5, %s1553_s5 }
 0x691   :  { %p2316_p4 = scmp.ne.s32.totalorder %s1553_s5, %s2315_s15  ;;  %p2321_p6 = scmp.lt.s32.totalorder %s2315_s15, %s2315_s15 }
 0x693   :  { %p2322_p7 = por %p2321_p6, %p2320_p5 }
 0x695   :  { %p2323_p8 = pnand %p2322_p7, %p2316_p4 }
 0x758   :  { %v1530_v21 = vpop.f32.mrb[16].mxu1 }
 0x759   :  { %v1531_v4 = vadd.f32 %v1530_v21, %v2752_v13  ;;  %v1894_v19 = vpop.f32.mrb[17].mxu1 }
 0x75b   :  { %v1662_v22 = vmul.f32 -1.442695, %v1531_v4 }
 0x75d   :  { %2069 = vpow2.f32 %v1662_v22 }
 0x767   :  { %v2070_v25 = vpop.eup %2069 }
 0x768   :  { %v1537_v26 = vadd.f32 1.0, %v2070_v25 }
 0x76a   :  { %2071 = vrcp.f32 %v1537_v26 }
 0x774   :  { %v2072_v50 = vpop.eup %2071 }
 0x775   :  { %1546 = vst.msk [vmem:[#allocation19 + $0x4] sm:$0xf] %vm946_vm5, %v2072_v50 }
 0x776   :  { %2326 = shalt.err (!%p2323_p8)
}
 0x777   :  { %s2327_s28 = scalar_lea.hbm %s2885_s10, 128 }
 0x778   :  { %p2328_p9 = scmp.ne.s32.totalorder %s2885_s10, %s2327_s28  ;;  %p2331_p10 = scmp.lt.u32.totalorder %s2327_s28, %s2885_s10 }
 0x77a   :  { %p2333_p11 = pnand %p2331_p10, %p2328_p9 }
 0x77c   :  { %2336 = shalt.err (!%p2333_p11)
}
 0x77d   :  { %1558 = dma.vmem_to_hbm [thread:$0]  %s1553_s5, 128, %s2885_s10, [#allocation4], %s2360_s7, %s2360_s7, %s2361_s20  }
 0x77e   :  { %2349 = dma.done.wait [#allocation4], 128  }
 0x77f   :  { %2350 = vsyncadd [#allocation4], 4294967168 }
 0x780   :  { %2351 = dma.done.wait [#allocation21], 1024  }
 0x781   :  { %2352 = vsyncadd [#allocation21], 4294966272 }
 0x782   :  { %1577 = vsyncpa [#allocation3], 1 }
 0x783   :  { %1578 = vsyncpa [#allocation6], 1 }
 0x784   :  { %1579 = vsyncpa [#allocation9], 1 }
 0x785   :  { %1580 = vsyncpa [#allocation12], 1 }
 0x786   :  { %1581 = vsyncpa [#allocation15], 1 }
 0x787   :  { %1582 = vsyncpa [#allocation18], 1 }
 0x788   :  { %1583 = vsyncpa [#allocation4], 1 }
 0x789   :  { %1584 = vsyncpa [#allocation21], 1 }

</bundles_post_ra>
